<compile_context>
chip_gen: v7x
topology: tpu7x:2x2x1
jax: 0.10.0
libtpu: 0.0.40
codegen_flags: <defaults>
</compile_context>

<pallas_src>
import functools

import jax
import jax.numpy as jnp
from jax.experimental import pallas as pl
from jax.experimental.pallas import tpu as pltpu


def _round_up(x, m):
    return (x + m - 1) // m * m


def _rate_confirm_kernel(x_ref, w_in_ref, b_in_ref, w_hid_ref, b_hid_ref,
                         w_out_ref, b_out_ref, out_ref, *, n_bands, n_sub):
    K, N = n_bands, n_sub

    # ---- block 1: Linear(in, H) + ReLU  (input BN folded into w_in/b_in) ----
    h = jnp.dot(x_ref[...], w_in_ref[...],           # bf16 x bf16 -> f32 acc
                preferred_element_type=jnp.float32)
    h = jnp.maximum(h + b_in_ref[...], 0.0)

    # ---- hidden blocks: Linear(H, H) + ReLU (prev BN folded into weights) ----
    for i in range(w_hid_ref.shape[0]):
        h = jnp.dot(h.astype(jnp.bfloat16), w_hid_ref[i],
                    preferred_element_type=jnp.float32)
        h = jnp.maximum(h + b_hid_ref[i], 0.0)

    # ---- output Linear(H, K*N)  (last BN and 1/temperature pre-folded) ----
    h = jnp.dot(h.astype(jnp.bfloat16), w_out_ref[...],
                preferred_element_type=jnp.float32)
    h = h + b_out_ref[...]                            # (bb, K*N), band-major

    # ---- softmax over the K bands (columns k*N + n), single dense store ----
    m = h[:, 0:N]
    for k in range(1, K):
        m = jnp.maximum(m, h[:, k * N:(k + 1) * N])   # (bb, N) per-n max over K
    es = [jnp.exp(h[:, k * N:(k + 1) * N] - m) for k in range(K)]
    s = es[0]
    for k in range(1, K):
        s = s + es[k]
    inv = pl.reciprocal(s, approx=True)               # EUP slot
    out_ref[...] = jnp.concatenate([e * inv for e in es], axis=-1)


def rate_confirm_alloc(x_bknn, params, *, n_bands, n_sub, block_b=128):
    """x_bknn: (B, K, N, N) channel gain. Returns (B, K, N) softmax over K."""
    w_in, b_in, w_hid, b_hid, w_out, b_out = params
    B, K, N, _ = x_bknn.shape
    assert K == n_bands and N == n_sub

    # preprocess() glue (keep_band_wise=False): mean over bands, flatten,
    # 10*log10(x + 1e-9).  Input BN is folded into w_in, so cast to bf16 here
    # (halves the input DMA; MXU wants bf16 anyway).
    xm = jnp.mean(x_bknn.astype(jnp.float32), axis=1).reshape(B, N * N)
    feats = (10.0 * jnp.log10(xm + 1e-9)).astype(jnp.bfloat16)

    # batch tiling: bb multiple of 16 (bf16 sublane packing); single grid step
    # when the whole batch fits in one tile (B=64 demo case).
    bb = min(block_b, _round_up(B, 16))
    Bp = _round_up(B, bb)
    if Bp != B:
        feats = jnp.pad(feats, ((0, Bp - B), (0, 0)))

    kern = functools.partial(_rate_confirm_kernel, n_bands=K, n_sub=N)

    def invariant(arr):
        nd = arr.ndim
        return pl.BlockSpec(arr.shape, lambda b, _nd=nd: (0,) * _nd)

    out = pl.pallas_call(
        kern,
        out_shape=jax.ShapeDtypeStruct((Bp, K * N), jnp.float32),
        grid=(Bp // bb,),
        in_specs=[
            pl.BlockSpec((bb, N * N), lambda b: (b, 0)),   # per-batch-tile
            invariant(w_in), invariant(b_in),
            invariant(w_hid), invariant(b_hid),
            invariant(w_out), invariant(b_out),            # VMEM-resident
        ],
        out_specs=pl.BlockSpec((bb, K * N), lambda b: (b, 0)),
        compiler_params=pltpu.CompilerParams(
            dimension_semantics=("parallel",)),            # TC sharding (v7x)
    )(feats, w_in, b_in, w_hid, b_hid, w_out, b_out)

    return out[:B].reshape(B, K, N)


# ---------------- deterministic parameter construction + folding ----------------

def _fold_bn(key, dim):
    kg, kb, km, kv = jax.random.split(key, 4)
    gamma = 1.0 + 0.1 * jax.random.normal(kg, (dim,), jnp.float32)
    beta = 0.02 * jax.random.normal(kb, (dim,), jnp.float32)
    r_mean = 0.1 * jax.random.normal(km, (dim,), jnp.float32)
    r_var = 1.0 + 0.1 * jax.random.uniform(kv, (dim,), jnp.float32)
    eps = 1e-5
    scale = gamma / jnp.sqrt(r_var + eps)
    shift = beta - r_mean * scale
    return scale, shift


def _linear(key, fan_in, fan_out):
    kw, kb = jax.random.split(key)
    # kaiming_normal_(nonlinearity='relu'); weight stored as (in, out)
    w = jax.random.normal(kw, (fan_in, fan_out), jnp.float32) * jnp.sqrt(2.0 / fan_in)
    bound = 1.0 / jnp.sqrt(fan_in)
    b = jax.random.uniform(kb, (fan_out,), jnp.float32, -bound, bound)
    return w, b


def make_params(key, n_sub, n_bands, hidden_dim, hidden_layers, temperature=1.0):
    """Builds eval-mode params and algebraically folds every BN affine and the
    1/temperature scale into the adjacent Linear layers (f32 folding, then the
    MXU operands are cast to bf16)."""
    input_size = n_sub * n_sub
    output_size = n_sub * n_bands
    H, L = hidden_dim, hidden_layers
    keys = jax.random.split(key, 4 + 2 * L)
    ki = iter(keys)

    scale0, shift0 = _fold_bn(next(ki), input_size)       # input BatchNorm1d

    w1, b1 = _linear(next(ki), input_size, H)             # Linear(in, H)
    s1, t1 = _fold_bn(next(ki), H)                        # BN after it

    w_h, b_h, s_h, t_h = [], [], [], []
    for _ in range(L):                                    # hidden Linear(H, H)
        w, b = _linear(next(ki), H, H)
        s, t = _fold_bn(next(ki), H)
        w_h.append(w); b_h.append(b); s_h.append(s); t_h.append(t)

    w_out, b_out = _linear(next(ki), H, output_size)      # Linear(H, K*N)

    # ---- fold input BN into the first Linear:  (x*s0 + t0) @ W + b ----
    w_in_f = scale0[:, None] * w1
    b_in_f = b1 + shift0 @ w1

    # ---- fold each post-ReLU BN into the NEXT Linear ----
    prev_s, prev_t = s1, t1
    w_hid_f, b_hid_f = [], []
    for i in range(L):
        w_hid_f.append(prev_s[:, None] * w_h[i])
        b_hid_f.append(b_h[i] + prev_t @ w_h[i])
        prev_s, prev_t = s_h[i], t_h[i]

    # ---- fold last BN and 1/temperature into the output Linear ----
    inv_t = 1.0 / float(temperature)
    w_out_f = (prev_s[:, None] * w_out) * inv_t
    b_out_f = (b_out + prev_t @ w_out) * inv_t

    w_hid_f = jnp.stack(w_hid_f, axis=0)                  # (L, H, H)
    b_hid_f = jnp.stack(b_hid_f, axis=0)[:, None, :]      # (L, 1, H) f32

    return (w_in_f.astype(jnp.bfloat16), b_in_f[None, :],          # (in,H) bf16, (1,H) f32
            w_hid_f.astype(jnp.bfloat16), b_hid_f,                  # (L,H,H) bf16, (L,1,H) f32
            w_out_f.astype(jnp.bfloat16), b_out_f[None, :])         # (H,K*N) bf16, (1,K*N) f32


# ------- pure-JAX reference mirroring the kernel's bf16 matmul casts -------

def reference_forward(x_bknn, params, n_bands, n_sub):
    w_in, b_in, w_hid, b_hid, w_out, b_out = params
    B = x_bknn.shape[0]
    xm = jnp.mean(x_bknn.astype(jnp.float32), axis=1).reshape(B, -1)
    h = (10.0 * jnp.log10(xm + 1e-9)).astype(jnp.bfloat16)
    h = jnp.dot(h, w_in, preferred_element_type=jnp.float32)
    h = jnp.maximum(h + b_in[0], 0.0)
    for i in range(w_hid.shape[0]):
        h = jnp.dot(h.astype(jnp.bfloat16), w_hid[i],
                    preferred_element_type=jnp.float32)
        h = jnp.maximum(h + b_hid[i, 0], 0.0)
    h = jnp.dot(h.astype(jnp.bfloat16), w_out,
                preferred_element_type=jnp.float32) + b_out[0]
    h = h.reshape(B, n_bands, n_sub)
    return jax.nn.softmax(h, axis=1)


if __name__ == "__main__":
    # small shapes: n_subnetworks=8, n_bands=4, hidden_dim=128, hidden_layers=4
    N_SUB, N_BANDS, HIDDEN, HIDDEN_LAYERS, BATCH = 8, 4, 128, 4, 64
    TEMPERATURE = 1.0

    key = jax.random.PRNGKey(0)
    k_params, k_x = jax.random.split(key)
    params = make_params(k_params, N_SUB, N_BANDS, HIDDEN, HIDDEN_LAYERS,
                         temperature=TEMPERATURE)

    # positive channel gains (B, K, N, N)
    x = jax.random.uniform(k_x, (BATCH, N_BANDS, N_SUB, N_SUB),
                           jnp.float32, minval=1e-4, maxval=1.0)

    # B=64 fits in a single batch tile -> one grid step (no per-step overhead)
    out = rate_confirm_alloc(x, params, n_bands=N_BANDS, n_sub=N_SUB,
                             block_b=128)
    out = jax.block_until_ready(out)

    ref = reference_forward(x, params, N_BANDS, N_SUB)

    assert out.shape == (BATCH, N_BANDS, N_SUB)
    assert bool(jnp.all(jnp.isfinite(out)))
    # probabilities over bands sum to ~1 (approx reciprocal in the kernel)
    assert bool(jnp.allclose(jnp.sum(out, axis=1), 1.0, atol=5e-3))
    # matches pure-JAX reference (same folded bf16 weights, f32 accumulation)
    err = float(jnp.max(jnp.abs(out - ref)))
    assert err < 2e-2, err

    print("KERNEL_OK")
</pallas_src>

<mosaic_0001>
module attributes {stable_mosaic.version = 11 : i64} {
  func.func @_rate_confirm_kernel(%arg0: i32, %arg1: memref<64x64xbf16, #tpu.memory_space<vmem>>, %arg2: memref<64x128xbf16, #tpu.memory_space<vmem>>, %arg3: memref<1x128xf32, #tpu.memory_space<vmem>>, %arg4: memref<4x128x128xbf16, #tpu.memory_space<vmem>>, %arg5: memref<4x1x128xf32, #tpu.memory_space<vmem>>, %arg6: memref<128x32xbf16, #tpu.memory_space<vmem>>, %arg7: memref<1x32xf32, #tpu.memory_space<vmem>>, %arg8: memref<64x32xf32, #tpu.memory_space<vmem>>) attributes {dimension_semantics = [#tpu.dimension_semantics<parallel>], iteration_bounds = array<i64: 1>, scalar_prefetch = 0 : i64, scratch_operands = 0 : i64, tpu.core_type = #tpu.core_type<tc>, window_params = [{transform_indices = @transform_0, window_bounds = array<i64: 64, 64>}, {pipeline_mode = #tpu.pipeline_mode<synchronous>, transform_indices = @transform_1, window_bounds = array<i64: 64, 128>}, {pipeline_mode = #tpu.pipeline_mode<synchronous>, transform_indices = @transform_2, window_bounds = array<i64: 1, 128>}, {pipeline_mode = #tpu.pipeline_mode<synchronous>, transform_indices = @transform_3, window_bounds = array<i64: 4, 128, 128>}, {pipeline_mode = #tpu.pipeline_mode<synchronous>, transform_indices = @transform_4, window_bounds = array<i64: 4, 1, 128>}, {pipeline_mode = #tpu.pipeline_mode<synchronous>, transform_indices = @transform_5, window_bounds = array<i64: 128, 32>}, {pipeline_mode = #tpu.pipeline_mode<synchronous>, transform_indices = @transform_6, window_bounds = array<i64: 1, 32>}, {transform_indices = @transform_7, window_bounds = array<i64: 64, 32>}]} {
    %c0 = arith.constant 0 : index
    %c0_0 = arith.constant 0 : index
    %0 = vector.load %arg1[%c0, %c0_0] : memref<64x64xbf16, #tpu.memory_space<vmem>>, vector<64x64xbf16>
    %c0_1 = arith.constant 0 : index
    %c0_2 = arith.constant 0 : index
    %1 = vector.load %arg2[%c0_1, %c0_2] : memref<64x128xbf16, #tpu.memory_space<vmem>>, vector<64x128xbf16>
    %cst = arith.constant dense<0.000000e+00> : vector<64x128xf32>
    %2 = tpu.matmul %0, %1, %cst {dimension_numbers = #tpu.dot_dimension_numbers<[1], [0], [0], [1], [0, 0, 1, 1], [], []>} : vector<64x64xbf16>, vector<64x128xbf16>, vector<64x128xf32> -> vector<64x128xf32>
    %c0_3 = arith.constant 0 : index
    %c0_4 = arith.constant 0 : index
    %3 = vector.load %arg3[%c0_3, %c0_4] : memref<1x128xf32, #tpu.memory_space<vmem>>, vector<1x128xf32>
    %4 = vector.broadcast %3 : vector<1x128xf32> to vector<64x128xf32>
    %5 = arith.addf %2, %4 : vector<64x128xf32>
    %cst_5 = arith.constant 0.000000e+00 : f32
    %6 = vector.broadcast %cst_5 : f32 to vector<64x128xf32>
    %7 = arith.maximumf %5, %6 : vector<64x128xf32>
    %8 = arith.truncf %7 : vector<64x128xf32> to vector<64x128xbf16>
    %c0_6 = arith.constant 0 : index
    %c0_7 = arith.constant 0 : index
    %c0_8 = arith.constant 0 : index
    %9 = vector.load %arg4[%c0_6, %c0_7, %c0_8] : memref<4x128x128xbf16, #tpu.memory_space<vmem>>, vector<1x128x128xbf16>
    %10 = vector.shape_cast %9 : vector<1x128x128xbf16> to vector<128x128xbf16>
    %cst_9 = arith.constant dense<0.000000e+00> : vector<64x128xf32>
    %11 = tpu.matmul %8, %10, %cst_9 {dimension_numbers = #tpu.dot_dimension_numbers<[1], [0], [0], [1], [0, 0, 1, 1], [], []>} : vector<64x128xbf16>, vector<128x128xbf16>, vector<64x128xf32> -> vector<64x128xf32>
    %c0_10 = arith.constant 0 : index
    %c0_11 = arith.constant 0 : index
    %c0_12 = arith.constant 0 : index
    %12 = vector.load %arg5[%c0_10, %c0_11, %c0_12] : memref<4x1x128xf32, #tpu.memory_space<vmem>>, vector<1x1x128xf32>
    %13 = vector.shape_cast %12 : vector<1x1x128xf32> to vector<1x128xf32>
    %14 = vector.broadcast %13 : vector<1x128xf32> to vector<64x128xf32>
    %15 = arith.addf %11, %14 : vector<64x128xf32>
    %cst_13 = arith.constant 0.000000e+00 : f32
    %16 = vector.broadcast %cst_13 : f32 to vector<64x128xf32>
    %17 = arith.maximumf %15, %16 : vector<64x128xf32>
    %18 = arith.truncf %17 : vector<64x128xf32> to vector<64x128xbf16>
    %c1 = arith.constant 1 : index
    %c0_14 = arith.constant 0 : index
    %c0_15 = arith.constant 0 : index
    %19 = vector.load %arg4[%c1, %c0_14, %c0_15] : memref<4x128x128xbf16, #tpu.memory_space<vmem>>, vector<1x128x128xbf16>
    %20 = vector.shape_cast %19 : vector<1x128x128xbf16> to vector<128x128xbf16>
    %cst_16 = arith.constant dense<0.000000e+00> : vector<64x128xf32>
    %21 = tpu.matmul %18, %20, %cst_16 {dimension_numbers = #tpu.dot_dimension_numbers<[1], [0], [0], [1], [0, 0, 1, 1], [], []>} : vector<64x128xbf16>, vector<128x128xbf16>, vector<64x128xf32> -> vector<64x128xf32>
    %c1_17 = arith.constant 1 : index
    %c0_18 = arith.constant 0 : index
    %c0_19 = arith.constant 0 : index
    %22 = vector.load %arg5[%c1_17, %c0_18, %c0_19] : memref<4x1x128xf32, #tpu.memory_space<vmem>>, vector<1x1x128xf32>
    %23 = vector.shape_cast %22 : vector<1x1x128xf32> to vector<1x128xf32>
    %24 = vector.broadcast %23 : vector<1x128xf32> to vector<64x128xf32>
    %25 = arith.addf %21, %24 : vector<64x128xf32>
    %cst_20 = arith.constant 0.000000e+00 : f32
    %26 = vector.broadcast %cst_20 : f32 to vector<64x128xf32>
    %27 = arith.maximumf %25, %26 : vector<64x128xf32>
    %28 = arith.truncf %27 : vector<64x128xf32> to vector<64x128xbf16>
    %c2 = arith.constant 2 : index
    %c0_21 = arith.constant 0 : index
    %c0_22 = arith.constant 0 : index
    %29 = vector.load %arg4[%c2, %c0_21, %c0_22] : memref<4x128x128xbf16, #tpu.memory_space<vmem>>, vector<1x128x128xbf16>
    %30 = vector.shape_cast %29 : vector<1x128x128xbf16> to vector<128x128xbf16>
    %cst_23 = arith.constant dense<0.000000e+00> : vector<64x128xf32>
    %31 = tpu.matmul %28, %30, %cst_23 {dimension_numbers = #tpu.dot_dimension_numbers<[1], [0], [0], [1], [0, 0, 1, 1], [], []>} : vector<64x128xbf16>, vector<128x128xbf16>, vector<64x128xf32> -> vector<64x128xf32>
    %c2_24 = arith.constant 2 : index
    %c0_25 = arith.constant 0 : index
    %c0_26 = arith.constant 0 : index
    %32 = vector.load %arg5[%c2_24, %c0_25, %c0_26] : memref<4x1x128xf32, #tpu.memory_space<vmem>>, vector<1x1x128xf32>
    %33 = vector.shape_cast %32 : vector<1x1x128xf32> to vector<1x128xf32>
    %34 = vector.broadcast %33 : vector<1x128xf32> to vector<64x128xf32>
    %35 = arith.addf %31, %34 : vector<64x128xf32>
    %cst_27 = arith.constant 0.000000e+00 : f32
    %36 = vector.broadcast %cst_27 : f32 to vector<64x128xf32>
    %37 = arith.maximumf %35, %36 : vector<64x128xf32>
    %38 = arith.truncf %37 : vector<64x128xf32> to vector<64x128xbf16>
    %c3 = arith.constant 3 : index
    %c0_28 = arith.constant 0 : index
    %c0_29 = arith.constant 0 : index
    %39 = vector.load %arg4[%c3, %c0_28, %c0_29] : memref<4x128x128xbf16, #tpu.memory_space<vmem>>, vector<1x128x128xbf16>
    %40 = vector.shape_cast %39 : vector<1x128x128xbf16> to vector<128x128xbf16>
    %cst_30 = arith.constant dense<0.000000e+00> : vector<64x128xf32>
    %41 = tpu.matmul %38, %40, %cst_30 {dimension_numbers = #tpu.dot_dimension_numbers<[1], [0], [0], [1], [0, 0, 1, 1], [], []>} : vector<64x128xbf16>, vector<128x128xbf16>, vector<64x128xf32> -> vector<64x128xf32>
    %c3_31 = arith.constant 3 : index
    %c0_32 = arith.constant 0 : index
    %c0_33 = arith.constant 0 : index
    %42 = vector.load %arg5[%c3_31, %c0_32, %c0_33] : memref<4x1x128xf32, #tpu.memory_space<vmem>>, vector<1x1x128xf32>
    %43 = vector.shape_cast %42 : vector<1x1x128xf32> to vector<1x128xf32>
    %44 = vector.broadcast %43 : vector<1x128xf32> to vector<64x128xf32>
    %45 = arith.addf %41, %44 : vector<64x128xf32>
    %cst_34 = arith.constant 0.000000e+00 : f32
    %46 = vector.broadcast %cst_34 : f32 to vector<64x128xf32>
    %47 = arith.maximumf %45, %46 : vector<64x128xf32>
    %48 = arith.truncf %47 : vector<64x128xf32> to vector<64x128xbf16>
    %c0_35 = arith.constant 0 : index
    %c0_36 = arith.constant 0 : index
    %49 = vector.load %arg6[%c0_35, %c0_36] : memref<128x32xbf16, #tpu.memory_space<vmem>>, vector<128x32xbf16>
    %cst_37 = arith.constant dense<0.000000e+00> : vector<64x32xf32>
    %50 = tpu.matmul %48, %49, %cst_37 {dimension_numbers = #tpu.dot_dimension_numbers<[1], [0], [0], [1], [0, 0, 1, 1], [], []>} : vector<64x128xbf16>, vector<128x32xbf16>, vector<64x32xf32> -> vector<64x32xf32>
    %c0_38 = arith.constant 0 : index
    %c0_39 = arith.constant 0 : index
    %51 = vector.load %arg7[%c0_38, %c0_39] : memref<1x32xf32, #tpu.memory_space<vmem>>, vector<1x32xf32>
    %52 = vector.broadcast %51 : vector<1x32xf32> to vector<64x32xf32>
    %53 = arith.addf %50, %52 : vector<64x32xf32>
    %54 = vector.extract_strided_slice %53 {offsets = [0, 0], sizes = [64, 8], strides = [1, 1]} : vector<64x32xf32> to vector<64x8xf32>
    %55 = vector.extract_strided_slice %53 {offsets = [0, 8], sizes = [64, 8], strides = [1, 1]} : vector<64x32xf32> to vector<64x8xf32>
    %56 = arith.maximumf %54, %55 : vector<64x8xf32>
    %57 = vector.extract_strided_slice %53 {offsets = [0, 16], sizes = [64, 8], strides = [1, 1]} : vector<64x32xf32> to vector<64x8xf32>
    %58 = arith.maximumf %56, %57 : vector<64x8xf32>
    %59 = vector.extract_strided_slice %53 {offsets = [0, 24], sizes = [64, 8], strides = [1, 1]} : vector<64x32xf32> to vector<64x8xf32>
    %60 = arith.maximumf %58, %59 : vector<64x8xf32>
    %61 = vector.extract_strided_slice %53 {offsets = [0, 0], sizes = [64, 8], strides = [1, 1]} : vector<64x32xf32> to vector<64x8xf32>
    %62 = arith.subf %61, %60 : vector<64x8xf32>
    %63 = math.exp %62 : vector<64x8xf32>
    %64 = vector.extract_strided_slice %53 {offsets = [0, 8], sizes = [64, 8], strides = [1, 1]} : vector<64x32xf32> to vector<64x8xf32>
    %65 = arith.subf %64, %60 : vector<64x8xf32>
    %66 = math.exp %65 : vector<64x8xf32>
    %67 = vector.extract_strided_slice %53 {offsets = [0, 16], sizes = [64, 8], strides = [1, 1]} : vector<64x32xf32> to vector<64x8xf32>
    %68 = arith.subf %67, %60 : vector<64x8xf32>
    %69 = math.exp %68 : vector<64x8xf32>
    %70 = vector.extract_strided_slice %53 {offsets = [0, 24], sizes = [64, 8], strides = [1, 1]} : vector<64x32xf32> to vector<64x8xf32>
    %71 = arith.subf %70, %60 : vector<64x8xf32>
    %72 = math.exp %71 : vector<64x8xf32>
    %73 = arith.addf %63, %66 : vector<64x8xf32>
    %74 = arith.addf %73, %69 : vector<64x8xf32>
    %75 = arith.addf %74, %72 : vector<64x8xf32>
    %76 = tpu.reciprocal %75 {approx = true} : vector<64x8xf32> -> vector<64x8xf32>
    %77 = arith.mulf %63, %76 : vector<64x8xf32>
    %78 = arith.mulf %66, %76 : vector<64x8xf32>
    %79 = arith.mulf %69, %76 : vector<64x8xf32>
    %80 = arith.mulf %72, %76 : vector<64x8xf32>
    %81 = tpu.concatenate %77, %78, %79, %80 in 1 : vector<64x8xf32>, vector<64x8xf32>, vector<64x8xf32>, vector<64x8xf32> -> vector<64x32xf32>
    %c0_40 = arith.constant 0 : index
    %c0_41 = arith.constant 0 : index
    %82 = vector.load %arg8[%c0_40, %c0_41] : memref<64x32xf32, #tpu.memory_space<vmem>>, vector<64x32xf32>
    tpu.vector_store %arg8[%c0_40, %c0_41], %81 {strides = array<i32>} : memref<64x32xf32, #tpu.memory_space<vmem>>, vector<64x32xf32>,
    return
  }
  func.func @transform_0(%arg0: i32) -> (i32, i32) {
    %c0_i32 = arith.constant 0 : i32
    %c0_i32_0 = arith.constant 0 : i32
    return %arg0, %c0_i32 : i32, i32
  }
  func.func @transform_1(%arg0: i32) -> (i32, i32) {
    %c0_i32 = arith.constant 0 : i32
    %c0_i32_0 = arith.constant 0 : i32
    %c0_i32_1 = arith.constant 0 : i32
    return %c0_i32, %c0_i32_0 : i32, i32
  }
  func.func @transform_2(%arg0: i32) -> (i32, i32) {
    %c0_i32 = arith.constant 0 : i32
    %c0_i32_0 = arith.constant 0 : i32
    %c0_i32_1 = arith.constant 0 : i32
    return %c0_i32, %c0_i32_0 : i32, i32
  }
  func.func @transform_3(%arg0: i32) -> (i32, i32, i32) {
    %c0_i32 = arith.constant 0 : i32
    %c0_i32_0 = arith.constant 0 : i32
    %c0_i32_1 = arith.constant 0 : i32
    %c0_i32_2 = arith.constant 0 : i32
    return %c0_i32, %c0_i32_0, %c0_i32_1 : i32, i32, i32
  }
  func.func @transform_4(%arg0: i32) -> (i32, i32, i32) {
    %c0_i32 = arith.constant 0 : i32
    %c0_i32_0 = arith.constant 0 : i32
    %c0_i32_1 = arith.constant 0 : i32
    %c0_i32_2 = arith.constant 0 : i32
    return %c0_i32, %c0_i32_0, %c0_i32_1 : i32, i32, i32
  }
  func.func @transform_5(%arg0: i32) -> (i32, i32) {
    %c0_i32 = arith.constant 0 : i32
    %c0_i32_0 = arith.constant 0 : i32
    %c0_i32_1 = arith.constant 0 : i32
    return %c0_i32, %c0_i32_0 : i32, i32
  }
  func.func @transform_6(%arg0: i32) -> (i32, i32) {
    %c0_i32 = arith.constant 0 : i32
    %c0_i32_0 = arith.constant 0 : i32
    %c0_i32_1 = arith.constant 0 : i32
    return %c0_i32, %c0_i32_0 : i32, i32
  }
  func.func @transform_7(%arg0: i32) -> (i32, i32) {
    %c0_i32 = arith.constant 0 : i32
    %c0_i32_0 = arith.constant 0 : i32
    return %arg0, %c0_i32 : i32, i32
  }
}

</mosaic_0001>

<bundles_post_ra>
// kernel: tpu_custom_call.1
= control target key start
LH: loop header
LB: loop body
LE: loop exit
PB: predicated region body
PF: predicated region fallthrough
CT: control target
= control target key end

     0   :  { %12 = vsyncpa [#allocation3], 0  ;;  %s1919_s24 = smov [#allocation2]   ;;  %s2447_s0 = inlined_call_operand.vmem [shape: bf16[64,64], index: 0, kind: input, shape index: {}]   ;;  %s2448_s1 = inlined_call_operand.vmem [shape: bf16[64,128], index: 1, kind: input, shape index: {}]   ;;  %s2449_s2 = inlined_call_operand.vmem [shape: f32[1,128], index: 2, kind: input, shape index: {}]   ;;  %s2450_s3 = inlined_call_operand.hbm [shape: bf16[4,128,128], index: 3, kind: input, shape index: {}]   ;;  %s2451_s4 = inlined_call_operand.vmem [shape: f32[4,1,128], index: 4, kind: input, shape index: {}]   ;;  %s2452_s5 = inlined_call_operand.vmem [shape: bf16[128,32], index: 5, kind: input, shape index: {}]   ;;  %s2453_s6 = inlined_call_operand.vmem [shape: f32[1,32], index: 6, kind: input, shape index: {}]   ;;  %s2454_s7 = inlined_call_operand.vmem [shape: f32[64,32], index: 7, kind: output, shape index: {}]  }
   0x1   :  { %s24_s25 = sshll.u32 %s1919_s24, 4  ;;  %s1895_s28 = scalar_lea.hbm %s2450_s3, 4096  ;;  %s25_s25 = int_to_ptr.vmem [resolvable:$true] %s24_s25 }
   0x2   :  { %p1896_p0 = scmp.ne.s32.totalorder %s2450_s3, %s1895_s28  ;;  %p1899_p1 = scmp.lt.u32.totalorder %s1895_s28, %s2450_s3 }
   0x4   :  { %p1901_p2 = pnand %p1899_p1, %p1896_p0 }
   0x6   :  { %1904 = shalt.err (!%p1901_p2)
}
   0x7   :  { %s1905_s10 = scalar_lea.vmem %s25_s25, 4096  ;;  %p1910_p4 = scmp.lt.s32.totalorder %s25_s25, %s25_s25 }
   0x8   :  { %p1906_p3 = scmp.ne.s32.totalorder %s25_s25, %s1905_s10  ;;  %p1911_p5 = scmp.lt.s32.totalorder %s1905_s10, %s1905_s10 }
   0xa   :  { %p1912_p6 = por %p1911_p5, %p1910_p4 }
   0xc   :  { %p1913_p7 = pnand %p1912_p6, %p1906_p3 }
   0xe   :  { %1916 = shalt.err (!%p1913_p7)
}
   0xf   :  { %s1920_s11 = smov 64   ;;  %s1921_s12 = smov 4  }
  0x10   :  { %30 = dma.hbm_to_vmem [thread:$0]  %s2450_s3, 4096, %s25_s25, [#allocation3], %s1920_s11, %s1920_s11, %s1921_s12  }
  0x11   :  { %1917 = dma.done.wait [#allocation3], 4096  }
  0x12   :  { %1918 = vsyncadd [#allocation3], 4294963200  ;;  %v1767_v0 = vld [vmem:[%s2448_s1] sm:$0xff]   ;;  %v1768_v1 = vld [vmem:[%s2448_s1 + $0x8] sm:$0xff]   ;;  %vm108_vm0 = vcmask 523264   ;;  %s1922_s28 = smov 112  }
  0x13   :  { %1622 = vmatprep.subr.bf16.mxu0 %v1767_v0  ;;  %v1769_v2 = vld [vmem:[%s2448_s1 + $0x10] sm:$0xff]   ;;  %v1771_v3 = vld [vmem:[%s2447_s0] sm:$0xff]   ;;  %v1770_v4 = vld [vmem:[%s2448_s1 + $0x18] sm:$0xff]   ;;  %s1924_s29 = smov 104   ;;  %s1927_s30 = smov 24   ;;  %vm1452_vm1 = vcmask 64512  }
  0x14   :  { %1623 = vmatpush3.bf16.msra.mxu0 %v1767_v0  ;;  %1630 = vmatprep.mubr.msk.bf16.mxu0 %vm108_vm0, %v1771_v3  ;;  %v1775_v5 = vld [vmem:[#allocation2] sm:$0xff]   ;;  %v1776_v6 = vld [vmem:[#allocation2 + $0x8] sm:$0xff]   ;;  %v1777_v8 = vld [vmem:[#allocation2 + $0x10] sm:$0xff]   ;;  %vm1461_vm2 = vcmask 130048   ;;  %vm1470_vm3 = vcmask 195584   ;;  %vm1479_vm4 = vcmask 261120  }
  0x15   :  { %1624 = vmatprep.subr.bf16.mxu0 %v1768_v1  ;;  %1638 = vmatprep.subr.bf16.mxu1 %v1775_v5  ;;  %v1772_v7 = vld [vmem:[%s2447_s0 + $0x8] sm:$0xff]   ;;  %v1773_v9 = vld [vmem:[%s2447_s0 + $0x10] sm:$0xff]   ;;  %v1778_v10 = vld [vmem:[#allocation2 + $0x18] sm:$0xff]  }
  0x16   :  { %1639 = vmatpush3.bf16.msra.mxu1 %v1775_v5  ;;  %v1779_v11 = vld [vmem:[#allocation2 + $0x20] sm:$0xff]   ;;  %v1774_v12 = vld [vmem:[%s2447_s0 + $0x18] sm:$0xff]   ;;  %v1780_v13 = vld [vmem:[#allocation2 + $0x28] sm:$0xff]   ;;  %s1923_s0 = smov 120  }
  0x17   :  { %1640 = vmatprep.subr.bf16.mxu1 %v1776_v6  ;;  %v1781_v14 = vld [vmem:[#allocation2 + $0x30] sm:$0xff]   ;;  %v1782_v15 = vld [vmem:[#allocation2 + $0x38] sm:$0xff]   ;;  %v1783_v16 = vld [vmem:[#allocation2 + $0x40] sm:$0xff]  }
  0x18   :  { %1625 = vmatpush3.bf16.msra.mxu0 %v1768_v1  ;;  %v1784_v17 = vld [vmem:[#allocation2 + $0x48] sm:$0xff]   ;;  %v1785_v18 = vld [vmem:[#allocation2 + $0x50] sm:$0xff]   ;;  %v1786_v19 = vld [vmem:[#allocation2 + $0x58] sm:$0xff]  }
  0x19   :  { %1626 = vmatprep.subr.bf16.mxu0 %v1769_v2  ;;  %v1787_v20 = vld [vmem:[#allocation2 + $0x60] sm:$0xff]   ;;  %v1788_v21 = vld [vmem:[#allocation2 + $0x68] sm:$0xff]   ;;  %v1789_v51 = vld [vmem:[#allocation2 + $0x70] sm:$0xff]  }
  0x1a   :  { %1641 = vmatpush3.bf16.msra.mxu1 %v1776_v6  ;;  %v1493_v22 = vld [vmem:[%s2449_s2] ss:$0 sm:$0xff]  ;;  %v1790_v52 = vld [vmem:[#allocation2 + $0x78] sm:$0xff]   ;;  %v1792_v54 = vld [vmem:[#allocation2 + $0x88] sm:$0xff]   ;;  %s1926_s2 = smov 16  }
  0x1b   :  { %1642 = vmatprep.subr.bf16.mxu1 %v1777_v8  ;;  %v1791_v53 = vld [vmem:[#allocation2 + $0x80] sm:$0xff]   ;;  %v1793_v55 = vld [vmem:[#allocation2 + $0x90] sm:$0xff]   ;;  %v1794_v56 = vld [vmem:[#allocation2 + $0x98] sm:$0xff]  }
  0x1c   :  { %1627 = vmatpush3.bf16.msra.mxu0 %v1769_v2  ;;  %v1795_v57 = vld [vmem:[#allocation2 + $0xa0] sm:$0xff]   ;;  %v1796_v58 = vld [vmem:[#allocation2 + $0xa8] sm:$0xff]  }
  0x1d   :  { %1628 = vmatprep.subr.bf16.mxu0 %v1770_v4  ;;  %v1506_v59 = vld [vmem:[%s2451_s4] ss:$0 sm:$0xff] }
  0x1e   :  { %1643 = vmatpush3.bf16.msra.mxu1 %v1777_v8 }
  0x1f   :  { %1644 = vmatprep.subr.bf16.mxu1 %v1778_v10 }
  0x20   :  { %1629 = vmatpush3.bf16.msra.mxu0 %v1770_v4 }
  0x21   :  { %1662 = vmatprep.subr.bf16.mxu0 %v1783_v16 }
  0x22   :  { %1645 = vmatpush3.bf16.msra.mxu1 %v1778_v10 }
  0x23   :  { %1631 = vmatmul.mubr.msk.bf16.vlgmr.msra.gmra.mrb[0].mxu0 %vm108_vm0, %v1772_v7  ;;  %1646 = vmatprep.subr.bf16.mxu1 %v1779_v11 }
  0x24   :  { %1634 = vmatprep.mubr.msk.bf16.mxu0 %vm108_vm0, %v1773_v9  ;;  %1663 = vmatpush3.bf16.msra.mxu0 %v1783_v16 }
  0x25   :  { %1664 = vmatprep.subr.bf16.mxu0 %v1784_v17 }
  0x26   :  { %1647 = vmatpush3.bf16.msra.mxu1 %v1779_v11 }
  0x27   :  { %1648 = vmatprep.subr.bf16.mxu1 %v1780_v13 }
  0x28   :  { %1665 = vmatpush3.bf16.msra.mxu0 %v1784_v17 }
  0x29   :  { %1666 = vmatprep.subr.bf16.mxu0 %v1785_v18 }
  0x2a   :  { %1649 = vmatpush3.bf16.msra.mxu1 %v1780_v13 }
  0x2b   :  { %1635 = vmatmul.mubr.msk.bf16.gmra.mrb[4].mxu0 %vm108_vm0, %v1774_v12  ;;  %1650 = vmatprep.subr.bf16.mxu1 %v1781_v14 }
  0x2c   :  { %1667 = vmatpush3.bf16.msra.mxu0 %v1785_v18 }
  0x2d   :  { %1668 = vmatprep.subr.bf16.mxu0 %v1786_v19 }
  0x2e   :  { %1651 = vmatpush3.bf16.msra.mxu1 %v1781_v14 }
  0x2f   :  { %1652 = vmatprep.subr.bf16.mxu1 %v1782_v15 }
  0x30   :  { %1669 = vmatpush3.bf16.msra.mxu0 %v1786_v19 }
  0x31   :  { %1670 = vmatprep.subr.bf16.mxu0 %v1787_v20 }
  0x32   :  { %1653 = vmatpush3.bf16.msra.mxu1 %v1782_v15 }
  0x33   :  { %1686 = vmatprep.subr.bf16.mxu1 %v1791_v53 }
  0x34   :  { %1671 = vmatpush3.bf16.msra.mxu0 %v1787_v20 }
  0x35   :  { %1672 = vmatprep.subr.bf16.mxu0 %v1788_v21 }
  0x38   :  { %1673 = vmatpush3.bf16.msra.mxu0 %v1788_v21 }
  0x39   :  { %1674 = vmatprep.subr.bf16.mxu0 %v1789_v51 }
  0x3c   :  { %1675 = vmatpush3.bf16.msra.mxu0 %v1789_v51 }
  0x3d   :  { %1676 = vmatprep.subr.bf16.mxu0 %v1790_v52 }
  0x40   :  { %1677 = vmatpush3.bf16.msra.mxu0 %v1790_v52 }
  0xf6   :  { %v1632_v23 = vpop.f32.mrb[0].mxu0 }
  0xf7   :  { %v164_v24 = vadd.f32 %v1632_v23, %v1493_v22  ;;  %v155_v25 = vpop.f32.mrb[1].mxu0 }
  0xf8   :  { %v156_v26 = vadd.f32 %v1493_v22, %v155_v25  ;;  %v1633_v27 = vpop.f32.mrb[2].mxu0  ;;  %v1798_v25 = vld [vmem:[#allocation2 + $0xb8] sm:$0xff]  }
  0xf9   :  { %v167_v28 = vadd.f32 %v1633_v27, %v1493_v22  ;;  %v158_v29 = vpop.f32.mrb[3].mxu0  ;;  %v188_v31 = vmax.f32 %v164_v24, 0.0  ;;  %v1797_v24 = vld [vmem:[#allocation2 + $0xb0] sm:$0xff]   ;;  %v1800_v27 = vld [vmem:[#allocation2 + $0xc8] sm:$0xff]  }
  0xfa   :  { %v159_v30 = vadd.f32 %v1493_v22, %v158_v29  ;;  %v186_v33 = vmax.f32 %v156_v26, 0.0  ;;  %v1799_v26 = vld [vmem:[#allocation2 + $0xc0] sm:$0xff]   ;;  %v1802_v29 = vld [vmem:[#allocation2 + $0xd8] sm:$0xff]  }
  0xfb   :  { %v189_v32 = vmax.f32 %v167_v28, 0.0  ;;  %1710 = vmatprep.subr.bf16.mxu0 %v1799_v26  ;;  %v1801_v28 = vld [vmem:[#allocation2 + $0xd0] sm:$0xff]  }
  0xfc   :  { %v187_v34 = vmax.f32 %v159_v30, 0.0  ;;  %v1803_v30 = vld [vmem:[#allocation2 + $0xe0] sm:$0xff]  }
  0xfd   :  { %v195_v35 = vpack.c.bf16 %v189_v32, %v188_v31  ;;  %v1804_v31 = vld [vmem:[#allocation2 + $0xe8] sm:$0xff]   ;;  %v1516_v32 = vld [vmem:[%s2451_s4 + $0x1] ss:$0 sm:$0xff] }
  0xfe   :  { %v1636_v36 = vpop.f32.mrb[4].mxu0  ;;  %v194_v37 = vpack.c.bf16 %v187_v34, %v186_v33 }
  0xff   :  { %v180_v38 = vadd.f32 %v1636_v36, %v1493_v22  ;;  %v171_v39 = vpop.f32.mrb[5].mxu0 }
 0x100   :  { %v172_v40 = vadd.f32 %v1493_v22, %v171_v39  ;;  %v1637_v41 = vpop.f32.mrb[6].mxu0  ;;  %1654 = vmatprep.mubr.bf16.mxu1 %v194_v37 }
 0x101   :  { %v192_v42 = vmax.f32 %v180_v38, 0.0  ;;  %v183_v43 = vadd.f32 %v1637_v41, %v1493_v22  ;;  %v174_v44 = vpop.f32.mrb[7].mxu0  ;;  %1655 = vmatmul.mubr.bf16.vlgmr.msra.gmra.mrb[0].mxu1 %v195_v35 }
 0x102   :  { %v190_v45 = vmax.f32 %v172_v40, 0.0  ;;  %v175_v46 = vadd.f32 %v1493_v22, %v174_v44  ;;  %1687 = vmatpush3.bf16.msra.mxu1 %v1791_v53 }
 0x103   :  { %v193_v47 = vmax.f32 %v183_v43, 0.0  ;;  %1688 = vmatprep.subr.bf16.mxu1 %v1792_v54 }
 0x104   :  { %v191_v48 = vmax.f32 %v175_v46, 0.0 }
 0x105   :  { %v197_v49 = vpack.c.bf16 %v193_v47, %v192_v42 }
 0x106   :  { %v196_v50 = vpack.c.bf16 %v191_v48, %v190_v45  ;;  %1689 = vmatpush3.bf16.msra.mxu1 %v1792_v54 }
 0x107   :  { %1690 = vmatprep.subr.bf16.mxu1 %v1793_v55 }
 0x108   :  { %1658 = vmatprep.mubr.bf16.mxu1 %v196_v50 }
 0x109   :  { %1659 = vmatmul.mubr.bf16.gmra.mrb[4].mxu1 %v197_v49 }
 0x10a   :  { %1691 = vmatpush3.bf16.msra.mxu1 %v1793_v55 }
 0x10b   :  { %1692 = vmatprep.subr.bf16.mxu1 %v1794_v56 }
 0x10e   :  { %1693 = vmatpush3.bf16.msra.mxu1 %v1794_v56 }
 0x10f   :  { %1694 = vmatprep.subr.bf16.mxu1 %v1795_v57 }
 0x112   :  { %1695 = vmatpush3.bf16.msra.mxu1 %v1795_v57 }
 0x113   :  { %1696 = vmatprep.subr.bf16.mxu1 %v1796_v58 }
 0x116   :  { %1697 = vmatpush3.bf16.msra.mxu1 %v1796_v58 }
 0x117   :  { %1698 = vmatprep.subr.bf16.mxu1 %v1797_v24 }
 0x11a   :  { %1699 = vmatpush3.bf16.msra.mxu1 %v1797_v24 }
 0x11b   :  { %1700 = vmatprep.subr.bf16.mxu1 %v1798_v25 }
 0x11e   :  { %1701 = vmatpush3.bf16.msra.mxu1 %v1798_v25 }
 0x1d4   :  { %v1656_v60 = vpop.f32.mrb[0].mxu1 }
 0x1d5   :  { %v312_v61 = vadd.f32 %v1656_v60, %v1506_v59  ;;  %v303_v62 = vpop.f32.mrb[1].mxu1 }
 0x1d6   :  { %v304_v63 = vadd.f32 %v1506_v59, %v303_v62  ;;  %v1657_v0 = vpop.f32.mrb[2].mxu1  ;;  %v1806_v62 = vld [vmem:[#allocation2 + $0xf8] sm:$0xff]  }
 0x1d7   :  { %v315_v1 = vadd.f32 %v1657_v0, %v1506_v59  ;;  %v306_v2 = vpop.f32.mrb[3].mxu1  ;;  %v336_v4 = vmax.f32 %v312_v61, 0.0  ;;  %v1805_v61 = vld [vmem:[#allocation2 + $0xf0] sm:$0xff]   ;;  %v1808_v0 = vld [vmem:[%s2452_s5 + $0x8] sm:$0xff]  }
 0x1d8   :  { %v307_v3 = vadd.f32 %v1506_v59, %v306_v2  ;;  %v334_v6 = vmax.f32 %v304_v63, 0.0  ;;  %v1807_v63 = vld [vmem:[%s2452_s5] sm:$0xff]   ;;  %v1810_v2 = vld [vmem:[%s2452_s5 + $0x18] sm:$0xff]  }
 0x1d9   :  { %v337_v5 = vmax.f32 %v315_v1, 0.0  ;;  %1734 = vmatprep.subr.bf16.mxu1 %v1807_v63  ;;  %v1809_v1 = vld [vmem:[%s2452_s5 + $0x10] sm:$0xff]  }
 0x1da   :  { %v335_v7 = vmax.f32 %v307_v3, 0.0  ;;  %v1811_v3 = vld [vmem:[%s2452_s5 + $0x20] sm:$0xff]  }
 0x1db   :  { %v343_v8 = vpack.c.bf16 %v337_v5, %v336_v4  ;;  %v1812_v4 = vld [vmem:[%s2452_s5 + $0x28] sm:$0xff]   ;;  %v1526_v5 = vld [vmem:[%s2451_s4 + $0x2] ss:$0 sm:$0xff] }
 0x1dc   :  { %v342_v9 = vpack.c.bf16 %v335_v7, %v334_v6  ;;  %v1660_v10 = vpop.f32.mrb[4].mxu1 }
 0x1dd   :  { %v328_v11 = vadd.f32 %v1660_v10, %v1506_v59  ;;  %v319_v12 = vpop.f32.mrb[5].mxu1 }
 0x1de   :  { %v320_v13 = vadd.f32 %v1506_v59, %v319_v12  ;;  %v1661_v14 = vpop.f32.mrb[6].mxu1  ;;  %1678 = vmatprep.mubr.bf16.mxu0 %v342_v9 }
 0x1df   :  { %v340_v15 = vmax.f32 %v328_v11, 0.0  ;;  %v331_v16 = vadd.f32 %v1661_v14, %v1506_v59  ;;  %v322_v17 = vpop.f32.mrb[7].mxu1  ;;  %1679 = vmatmul.mubr.bf16.vlgmr.msra.gmra.mrb[8].mxu0 %v343_v8 }
 0x1e0   :  { %v338_v18 = vmax.f32 %v320_v13, 0.0  ;;  %v323_v19 = vadd.f32 %v1506_v59, %v322_v17  ;;  %1711 = vmatpush3.bf16.msra.mxu0 %v1799_v26 }
 0x1e1   :  { %v341_v20 = vmax.f32 %v331_v16, 0.0  ;;  %1712 = vmatprep.subr.bf16.mxu0 %v1800_v27 }
 0x1e2   :  { %v339_v21 = vmax.f32 %v323_v19, 0.0 }
 0x1e3   :  { %v345_v22 = vpack.c.bf16 %v341_v20, %v340_v15 }
 0x1e4   :  { %v344_v23 = vpack.c.bf16 %v339_v21, %v338_v18  ;;  %1713 = vmatpush3.bf16.msra.mxu0 %v1800_v27 }
 0x1e5   :  { %1714 = vmatprep.subr.bf16.mxu0 %v1801_v28 }
 0x1e6   :  { %1682 = vmatprep.mubr.bf16.mxu0 %v344_v23 }
 0x1e7   :  { %1683 = vmatmul.mubr.bf16.gmra.mrb[12].mxu0 %v345_v22 }
 0x1e8   :  { %1715 = vmatpush3.bf16.msra.mxu0 %v1801_v28 }
 0x1e9   :  { %1716 = vmatprep.subr.bf16.mxu0 %v1802_v29 }
 0x1ec   :  { %1717 = vmatpush3.bf16.msra.mxu0 %v1802_v29 }
 0x1ed   :  { %1718 = vmatprep.subr.bf16.mxu0 %v1803_v30 }
 0x1f0   :  { %1719 = vmatpush3.bf16.msra.mxu0 %v1803_v30 }
 0x1f1   :  { %1720 = vmatprep.subr.bf16.mxu0 %v1804_v31 }
 0x1f4   :  { %1721 = vmatpush3.bf16.msra.mxu0 %v1804_v31 }
 0x1f5   :  { %1722 = vmatprep.subr.bf16.mxu0 %v1805_v61 }
 0x1f8   :  { %1723 = vmatpush3.bf16.msra.mxu0 %v1805_v61 }
 0x1f9   :  { %1724 = vmatprep.subr.bf16.mxu0 %v1806_v62 }
 0x1fc   :  { %1725 = vmatpush3.bf16.msra.mxu0 %v1806_v62 }
 0x2b2   :  { %v1680_v33 = vpop.f32.mrb[8].mxu0 }
 0x2b3   :  { %v462_v34 = vadd.f32 %v1680_v33, %v1516_v32  ;;  %v453_v35 = vpop.f32.mrb[9].mxu0 }
 0x2b4   :  { %v454_v36 = vadd.f32 %v1516_v32, %v453_v35  ;;  %v1681_v37 = vpop.f32.mrb[10].mxu0  ;;  %v1814_v35 = vld [vmem:[%s2452_s5 + $0x38] sm:$0xff]  }
 0x2b5   :  { %v465_v38 = vadd.f32 %v1681_v37, %v1516_v32  ;;  %v456_v39 = vpop.f32.mrb[11].mxu0  ;;  %v486_v41 = vmax.f32 %v462_v34, 0.0  ;;  %v1813_v34 = vld [vmem:[%s2452_s5 + $0x30] sm:$0xff]  }
 0x2b6   :  { %v457_v40 = vadd.f32 %v1516_v32, %v456_v39  ;;  %v484_v43 = vmax.f32 %v454_v36, 0.0  ;;  %v1536_v36 = vld [vmem:[%s2451_s4 + $0x3] ss:$0 sm:$0xff] }
 0x2b7   :  { %v487_v42 = vmax.f32 %v465_v38, 0.0 }
 0x2b8   :  { %v485_v44 = vmax.f32 %v457_v40, 0.0 }
 0x2b9   :  { %v493_v45 = vpack.c.bf16 %v487_v42, %v486_v41 }
 0x2ba   :  { %v492_v46 = vpack.c.bf16 %v485_v44, %v484_v43  ;;  %v1684_v47 = vpop.f32.mrb[12].mxu0 }
 0x2bb   :  { %v478_v48 = vadd.f32 %v1684_v47, %v1516_v32  ;;  %v469_v49 = vpop.f32.mrb[13].mxu0 }
 0x2bc   :  { %v470_v50 = vadd.f32 %v1516_v32, %v469_v49  ;;  %v1685_v51 = vpop.f32.mrb[14].mxu0  ;;  %1702 = vmatprep.mubr.bf16.mxu1 %v492_v46 }
 0x2bd   :  { %v490_v52 = vmax.f32 %v478_v48, 0.0  ;;  %v481_v53 = vadd.f32 %v1685_v51, %v1516_v32  ;;  %v472_v54 = vpop.f32.mrb[15].mxu0  ;;  %1703 = vmatmul.mubr.bf16.vlgmr.msra.gmra.mrb[8].mxu1 %v493_v45 }
 0x2be   :  { %v488_v55 = vmax.f32 %v470_v50, 0.0  ;;  %v473_v56 = vadd.f32 %v1516_v32, %v472_v54  ;;  %1735 = vmatpush3.bf16.msra.mxu1 %v1807_v63 }
 0x2bf   :  { %v491_v57 = vmax.f32 %v481_v53, 0.0  ;;  %1736 = vmatprep.subr.bf16.mxu1 %v1808_v0 }
 0x2c0   :  { %v489_v58 = vmax.f32 %v473_v56, 0.0 }
 0x2c1   :  { %v495_v59 = vpack.c.bf16 %v491_v57, %v490_v52 }
 0x2c2   :  { %v494_v60 = vpack.c.bf16 %v489_v58, %v488_v55  ;;  %1737 = vmatpush3.bf16.msra.mxu1 %v1808_v0 }
 0x2c3   :  { %1738 = vmatprep.subr.bf16.mxu1 %v1809_v1 }
 0x2c4   :  { %1706 = vmatprep.mubr.bf16.mxu1 %v494_v60 }
 0x2c5   :  { %1707 = vmatmul.mubr.bf16.gmra.mrb[12].mxu1 %v495_v59 }
 0x2c6   :  { %1739 = vmatpush3.bf16.msra.mxu1 %v1809_v1  ;;  %v1545_v1 = vld [vmem:[%s2453_s6] ss:$0 sm:$0xff]  ;;  %s1925_s6 = smov 8  }
 0x2c7   :  { %1740 = vmatprep.subr.bf16.mxu1 %v1810_v2 }
 0x2ca   :  { %1741 = vmatpush3.bf16.msra.mxu1 %v1810_v2 }
 0x2cb   :  { %1742 = vmatprep.subr.bf16.mxu1 %v1811_v3 }
 0x2ce   :  { %1743 = vmatpush3.bf16.msra.mxu1 %v1811_v3 }
 0x2cf   :  { %1744 = vmatprep.subr.bf16.mxu1 %v1812_v4 }
 0x2d2   :  { %1745 = vmatpush3.bf16.msra.mxu1 %v1812_v4 }
 0x2d3   :  { %1746 = vmatprep.subr.bf16.mxu1 %v1813_v34 }
 0x2d6   :  { %1747 = vmatpush3.bf16.msra.mxu1 %v1813_v34 }
 0x2d7   :  { %1748 = vmatprep.subr.bf16.mxu1 %v1814_v35 }
 0x2da   :  { %1749 = vmatpush3.bf16.msra.mxu1 %v1814_v35 }
 0x390   :  { %v1704_v6 = vpop.f32.mrb[8].mxu1 }
 0x391   :  { %v612_v7 = vadd.f32 %v1704_v6, %v1526_v5  ;;  %v603_v8 = vpop.f32.mrb[9].mxu1 }
 0x392   :  { %v604_v9 = vadd.f32 %v1526_v5, %v603_v8  ;;  %v1705_v10 = vpop.f32.mrb[10].mxu1 }
 0x393   :  { %v615_v11 = vadd.f32 %v1705_v10, %v1526_v5  ;;  %v606_v12 = vpop.f32.mrb[11].mxu1  ;;  %v636_v14 = vmax.f32 %v612_v7, 0.0 }
 0x394   :  { %v607_v13 = vadd.f32 %v1526_v5, %v606_v12  ;;  %v634_v16 = vmax.f32 %v604_v9, 0.0 }
 0x395   :  { %v637_v15 = vmax.f32 %v615_v11, 0.0 }
 0x396   :  { %v635_v17 = vmax.f32 %v607_v13, 0.0 }
 0x397   :  { %v643_v18 = vpack.c.bf16 %v637_v15, %v636_v14 }
 0x398   :  { %v642_v19 = vpack.c.bf16 %v635_v17, %v634_v16  ;;  %v1708_v20 = vpop.f32.mrb[12].mxu1 }
 0x399   :  { %v628_v21 = vadd.f32 %v1708_v20, %v1526_v5  ;;  %v619_v22 = vpop.f32.mrb[13].mxu1 }
 0x39a   :  { %v620_v23 = vadd.f32 %v1526_v5, %v619_v22  ;;  %v1709_v24 = vpop.f32.mrb[14].mxu1  ;;  %1726 = vmatprep.mubr.bf16.mxu0 %v642_v19 }
 0x39b   :  { %v640_v25 = vmax.f32 %v628_v21, 0.0  ;;  %v631_v26 = vadd.f32 %v1709_v24, %v1526_v5  ;;  %v622_v27 = vpop.f32.mrb[15].mxu1  ;;  %1727 = vmatmul.mubr.bf16.vlgmr.msra.gmra.mrb[16].mxu0 %v643_v18 }
 0x39c   :  { %v638_v28 = vmax.f32 %v620_v23, 0.0  ;;  %v623_v29 = vadd.f32 %v1526_v5, %v622_v27 }
 0x39d   :  { %v641_v30 = vmax.f32 %v631_v26, 0.0 }
 0x39e   :  { %v639_v31 = vmax.f32 %v623_v29, 0.0 }
 0x39f   :  { %v645_v32 = vpack.c.bf16 %v641_v30, %v640_v25 }
 0x3a0   :  { %v644_v33 = vpack.c.bf16 %v639_v31, %v638_v28 }
 0x3a2   :  { %1730 = vmatprep.mubr.bf16.mxu0 %v644_v33 }
 0x3a3   :  { %1731 = vmatmul.mubr.bf16.gmra.mrb[20].mxu0 %v645_v32 }
 0x46e   :  { %v1728_v37 = vpop.f32.mrb[16].mxu0 }
 0x46f   :  { %v762_v38 = vadd.f32 %v1728_v37, %v1536_v36  ;;  %v753_v39 = vpop.f32.mrb[17].mxu0 }
 0x470   :  { %v754_v40 = vadd.f32 %v1536_v36, %v753_v39  ;;  %v1729_v41 = vpop.f32.mrb[18].mxu0 }
 0x471   :  { %v765_v42 = vadd.f32 %v1729_v41, %v1536_v36  ;;  %v756_v43 = vpop.f32.mrb[19].mxu0  ;;  %v786_v45 = vmax.f32 %v762_v38, 0.0 }
 0x472   :  { %v757_v44 = vadd.f32 %v1536_v36, %v756_v43  ;;  %v784_v47 = vmax.f32 %v754_v40, 0.0 }
 0x473   :  { %v787_v46 = vmax.f32 %v765_v42, 0.0 }
 0x474   :  { %v785_v48 = vmax.f32 %v757_v44, 0.0 }
 0x475   :  { %v793_v49 = vpack.c.bf16 %v787_v46, %v786_v45 }
 0x476   :  { %v792_v50 = vpack.c.bf16 %v785_v48, %v784_v47  ;;  %v1732_v51 = vpop.f32.mrb[20].mxu0 }
 0x477   :  { %v778_v52 = vadd.f32 %v1732_v51, %v1536_v36  ;;  %v769_v53 = vpop.f32.mrb[21].mxu0 }
 0x478   :  { %v770_v54 = vadd.f32 %v1536_v36, %v769_v53  ;;  %v1733_v55 = vpop.f32.mrb[22].mxu0  ;;  %1750 = vmatprep.mubr.bf16.mxu1 %v792_v50 }
 0x479   :  { %v781_v56 = vadd.f32 %v1733_v55, %v1536_v36  ;;  %v772_v57 = vpop.f32.mrb[23].mxu0  ;;  %1751 = vmatmul.mubr.bf16.vlgmr.msra.gmra.mrb[16].mxu1 %v793_v49  ;;  %v790_v59 = vmax.f32 %v778_v52, 0.0 }
 0x47a   :  { %v773_v58 = vadd.f32 %v1536_v36, %v772_v57  ;;  %v788_v61 = vmax.f32 %v770_v54, 0.0 }
 0x47b   :  { %v791_v60 = vmax.f32 %v781_v56, 0.0 }
 0x47c   :  { %v789_v62 = vmax.f32 %v773_v58, 0.0 }
 0x47d   :  { %v795_v63 = vpack.c.bf16 %v791_v60, %v790_v59 }
 0x47e   :  { %v794_v0 = vpack.c.bf16 %v789_v62, %v788_v61 }
 0x480   :  { %1754 = vmatprep.mubr.bf16.mxu1 %v794_v0 }
 0x481   :  { %1755 = vmatmul.mubr.bf16.gmra.mrb[20].mxu1 %v795_v63 }
 0x54c   :  { %v1752_v2 = vpop.f32.mrb[16].mxu1 }
 0x54d   :  { %v2050_v3 = vadd.f32 %v1752_v2, %v1545_v1  ;;  %v901_v4 = vpop.f32.mrb[17].mxu1 }
 0x54e   :  { %v1753_v5 = vpop.f32.mrb[18].mxu1  ;;  %v2062_v9 = vadd.f32 %v1545_v1, %v901_v4 }
 0x54f   :  { %976 = vrot.lane.b32.xlu0 %v2050_v3, %s1922_s28  ;;  %944 = vrot.lane.b32.xlu1 %v2050_v3, %s1923_s0  ;;  %v904_v6 = vpop.f32.mrb[19].mxu1  ;;  %v2056_v7 = vadd.f32 %v1753_v5, %v1545_v1 }
 0x550   :  { %v2072_v13 = vadd.f32 %v1545_v1, %v904_v6 }
 0x553   :  { %1008 = vrot.lane.b32.xlu0 %v2050_v3, %s1924_s29  ;;  %946 = vrot.lane.b32.xlu1 %v2056_v7, %s1923_s0 }
 0x554   :  { %v1756_v8 = vpop.f32.mrb[20].mxu1 }
 0x555   :  { %v917_v10 = vpop.f32.mrb[21].mxu1  ;;  %v2082_v14 = vadd.f32 %v1756_v8, %v1545_v1 }
 0x556   :  { %v1757_v11 = vpop.f32.mrb[22].mxu1  ;;  %v2094_v16 = vadd.f32 %v1545_v1, %v917_v10 }
 0x557   :  { %978 = vrot.lane.b32.xlu1 %v2056_v7, %s1922_s28  ;;  %v920_v12 = vpop.f32.mrb[23].mxu1  ;;  %940 = vrot.lane.b32.xlu0 %v2062_v9, %s1923_s0  ;;  %v2084_v15 = vadd.f32 %v1757_v11, %v1545_v1 }
 0x558   :  { %v2096_v17 = vadd.f32 %v1545_v1, %v920_v12 }
 0x55b   :  { %1010 = vrot.lane.b32.xlu1 %v2056_v7, %s1924_s29  ;;  %972 = vrot.lane.b32.xlu0 %v2062_v9, %s1922_s28 }
 0x55f   :  { %974 = vrot.lane.b32.xlu1 %v2072_v13, %s1922_s28  ;;  %1004 = vrot.lane.b32.xlu0 %v2062_v9, %s1924_s29 }
 0x563   :  { %1006 = vrot.lane.b32.xlu1 %v2072_v13, %s1924_s29  ;;  %942 = vrot.lane.b32.xlu0 %v2072_v13, %s1923_s0 }
 0x567   :  { %954 = vrot.lane.b32.xlu1 %v2084_v15, %s1923_s0  ;;  %952 = vrot.lane.b32.xlu0 %v2082_v14, %s1923_s0 }
 0x56b   :  { %986 = vrot.lane.b32.xlu1 %v2084_v15, %s1922_s28  ;;  %984 = vrot.lane.b32.xlu0 %v2082_v14, %s1922_s28 }
 0x56f   :  { %950 = vrot.lane.b32.xlu1 %v2096_v17, %s1923_s0  ;;  %948 = vrot.lane.b32.xlu0 %v2094_v16, %s1923_s0 }
 0x573   :  { %982 = vrot.lane.b32.xlu1 %v2096_v17, %s1922_s28  ;;  %980 = vrot.lane.b32.xlu0 %v2094_v16, %s1922_s28 }
 0x577   :  { %1014 = vrot.lane.b32.xlu1 %v2096_v17, %s1924_s29  ;;  %1012 = vrot.lane.b32.xlu0 %v2094_v16, %s1924_s29 }
 0x57b   :  { %1018 = vrot.lane.b32.xlu1 %v2084_v15, %s1924_s29  ;;  %1016 = vrot.lane.b32.xlu0 %v2082_v14, %s1924_s29 }
 0x5c1   :  { %v977_v18 = vpop.permute.xlu0 %976  ;;  %v945_v19 = vpop.permute.xlu1 %944 }
 0x5c2   :  { %v966_v20 = vmax.f32 %v2050_v3, %v945_v19 }
 0x5c4   :  { %v998_v21 = vmax.f32 %v966_v20, %v977_v18 }
 0x5c5   :  { %v1009_v22 = vpop.permute.xlu0 %1008  ;;  %v947_v23 = vpop.permute.xlu1 %946 }
 0x5c6   :  { %v2115_v24 = vmax.f32 %v998_v21, %v1009_v22  ;;  %v967_v27 = vmax.f32 %v2056_v7, %v947_v23 }
 0x5c8   :  { %1072 = vrot.lane.b32.xlu0 %v2115_v24, %s1925_s6 }
 0x5c9   :  { %v979_v25 = vpop.permute.xlu1 %978  ;;  %v941_v26 = vpop.permute.xlu0 %940 }
 0x5ca   :  { %v999_v28 = vmax.f32 %v967_v27, %v979_v25  ;;  %v964_v31 = vmax.f32 %v2062_v9, %v941_v26 }
 0x5cc   :  { %1120 = vrot.lane.b32.xlu0 %v2115_v24, %s1926_s2 }
 0x5cd   :  { %v1011_v29 = vpop.permute.xlu1 %1010  ;;  %v973_v30 = vpop.permute.xlu0 %972 }
 0x5ce   :  { %v2123_v32 = vmax.f32 %v999_v28, %v1011_v29  ;;  %v996_v33 = vmax.f32 %v964_v31, %v973_v30 }
 0x5d0   :  { %1074 = vrot.lane.b32.xlu1 %v2123_v32, %s1925_s6  ;;  %1168 = vrot.lane.b32.xlu0 %v2115_v24, %s1927_s30 }
 0x5d1   :  { %v975_v34 = vpop.permute.xlu1 %974  ;;  %v1005_v35 = vpop.permute.xlu0 %1004 }
 0x5d2   :  { %v2129_v36 = vmax.f32 %v996_v33, %v1005_v35 }
 0x5d4   :  { %1122 = vrot.lane.b32.xlu1 %v2123_v32, %s1926_s2  ;;  %1068 = vrot.lane.b32.xlu0 %v2129_v36, %s1925_s6 }
 0x5d5   :  { %v1007_v37 = vpop.permute.xlu1 %1006  ;;  %v943_v38 = vpop.permute.xlu0 %942 }
 0x5d6   :  { %v965_v39 = vmax.f32 %v2072_v13, %v943_v38 }
 0x5d8   :  { %v997_v40 = vmax.f32 %v965_v39, %v975_v34  ;;  %1170 = vrot.lane.b32.xlu1 %v2123_v32, %s1927_s30  ;;  %1116 = vrot.lane.b32.xlu0 %v2129_v36, %s1926_s2 }
 0x5d9   :  { %v955_v41 = vpop.permute.xlu1 %954  ;;  %v953_v42 = vpop.permute.xlu0 %952 }
 0x5da   :  { %v2140_v43 = vmax.f32 %v997_v40, %v1007_v37  ;;  %v971_v52 = vmax.f32 %v2084_v15, %v955_v41  ;;  %v970_v53 = vmax.f32 %v2082_v14, %v953_v42 }
 0x5dc   :  { %1164 = vrot.lane.b32.xlu0 %v2129_v36, %s1927_s30  ;;  %1070 = vrot.lane.b32.xlu1 %v2140_v43, %s1925_s6 }
 0x5dd   :  { %v987_v44 = vpop.permute.xlu1 %986  ;;  %v985_v45 = vpop.permute.xlu0 %984 }
 0x5de   :  { %v1003_v54 = vmax.f32 %v971_v52, %v987_v44  ;;  %v1002_v55 = vmax.f32 %v970_v53, %v985_v45 }
 0x5e0   :  { %1118 = vrot.lane.b32.xlu1 %v2140_v43, %s1926_s2 }
 0x5e1   :  { %v951_v46 = vpop.permute.xlu1 %950  ;;  %v949_v47 = vpop.permute.xlu0 %948 }
 0x5e2   :  { %v969_v60 = vmax.f32 %v2096_v17, %v951_v46  ;;  %v968_v61 = vmax.f32 %v2094_v16, %v949_v47 }
 0x5e4   :  { %1166 = vrot.lane.b32.xlu1 %v2140_v43, %s1927_s30 }
 0x5e5   :  { %v983_v48 = vpop.permute.xlu1 %982  ;;  %v981_v49 = vpop.permute.xlu0 %980 }
 0x5e6   :  { %v1001_v62 = vmax.f32 %v969_v60, %v983_v48  ;;  %v1000_v63 = vmax.f32 %v968_v61, %v981_v49 }
 0x5e9   :  { %v1015_v50 = vpop.permute.xlu1 %1014  ;;  %v1013_v51 = vpop.permute.xlu0 %1012 }
 0x5ea   :  { %v2166_v0 = vmax.f32 %v1001_v62, %v1015_v50  ;;  %v2168_v1 = vmax.f32 %v1000_v63, %v1013_v51 }
 0x5ed   :  { %v1019_v56 = vpop.permute.xlu1 %1018  ;;  %v1017_v57 = vpop.permute.xlu0 %1016 }
 0x5ee   :  { %v2152_v58 = vmax.f32 %v1003_v54, %v1019_v56  ;;  %v2154_v59 = vmax.f32 %v1002_v55, %v1017_v57 }
 0x5f0   :  { %1082 = vrot.lane.b32.xlu1 %v2152_v58, %s1925_s6  ;;  %1080 = vrot.lane.b32.xlu0 %v2154_v59, %s1925_s6 }
 0x5f4   :  { %1130 = vrot.lane.b32.xlu1 %v2152_v58, %s1926_s2  ;;  %1128 = vrot.lane.b32.xlu0 %v2154_v59, %s1926_s2 }
 0x5f8   :  { %1078 = vrot.lane.b32.xlu1 %v2166_v0, %s1925_s6  ;;  %1076 = vrot.lane.b32.xlu0 %v2168_v1, %s1925_s6 }
 0x5fc   :  { %1126 = vrot.lane.b32.xlu1 %v2166_v0, %s1926_s2  ;;  %1124 = vrot.lane.b32.xlu0 %v2168_v1, %s1926_s2 }
 0x600   :  { %1174 = vrot.lane.b32.xlu1 %v2166_v0, %s1927_s30  ;;  %1172 = vrot.lane.b32.xlu0 %v2168_v1, %s1927_s30 }
 0x604   :  { %1178 = vrot.lane.b32.xlu1 %v2152_v58, %s1927_s30  ;;  %1176 = vrot.lane.b32.xlu0 %v2154_v59, %s1927_s30 }
 0x63a   :  { %v1073_v2 = vpop.permute.xlu0 %1072 }
 0x63b   :  { %v1094_v4 = vsub.f32 %v2050_v3, %v1073_v2 }
 0x63d   :  { %v1104_v5 = vmul.f32 1.442695, %v1094_v4 }
 0x63e   :  { %v1121_v6 = vpop.permute.xlu0 %1120 }
 0x63f   :  { %1815 = vpow2.f32 %v1104_v5  ;;  %v1142_v8 = vsub.f32 %v2050_v3, %v1121_v6 }
 0x641   :  { %v1152_v10 = vmul.f32 1.442695, %v1142_v8 }
 0x642   :  { %v1075_v11 = vpop.permute.xlu1 %1074  ;;  %v1169_v12 = vpop.permute.xlu0 %1168 }
 0x643   :  { %1817 = vpow2.f32 %v1152_v10  ;;  %v1095_v18 = vsub.f32 %v2056_v7, %v1075_v11  ;;  %v1190_v19 = vsub.f32 %v2050_v3, %v1169_v12 }
 0x645   :  { %v1106_v20 = vmul.f32 1.442695, %v1095_v18  ;;  %v1200_v21 = vmul.f32 1.442695, %v1190_v19 }
 0x646   :  { %v1123_v22 = vpop.permute.xlu1 %1122  ;;  %v1069_v23 = vpop.permute.xlu0 %1068 }
 0x647   :  { %1819 = vpow2.f32 %v1106_v20  ;;  %v1143_v25 = vsub.f32 %v2056_v7, %v1123_v22  ;;  %v1092_v26 = vsub.f32 %v2062_v9, %v1069_v23 }
 0x648   :  { %1821 = vpow2.f32 %v1200_v21 }
 0x649   :  { %v2192_v27 = vpop.eup %1815  ;;  %v1154_v28 = vmul.f32 1.442695, %v1143_v25  ;;  %v1100_v29 = vmul.f32 1.442695, %v1092_v26 }
 0x64a   :  { %v1171_v30 = vpop.permute.xlu1 %1170  ;;  %1224 = vrot.lane.b32.xlu0 %v2192_v27, %s1923_s0  ;;  %v1117_v31 = vpop.permute.xlu0 %1116 }
 0x64b   :  { %1823 = vpow2.f32 %v1154_v28  ;;  %v1191_v33 = vsub.f32 %v2056_v7, %v1171_v30  ;;  %v1140_v34 = vsub.f32 %v2062_v9, %v1117_v31 }
 0x64c   :  { %1825 = vpow2.f32 %v1100_v29 }
 0x64d   :  { %v2198_v35 = vpop.eup %1817  ;;  %v1202_v37 = vmul.f32 1.442695, %v1191_v33  ;;  %v1148_v38 = vmul.f32 1.442695, %v1140_v34 }
 0x64e   :  { %v1071_v39 = vpop.permute.xlu1 %1070  ;;  %1264 = vrot.lane.b32.xlu0 %v2198_v35, %s1922_s28  ;;  %v1165_v40 = vpop.permute.xlu0 %1164 }
 0x64f   :  { %1827 = vpow2.f32 %v1202_v37  ;;  %v1093_v41 = vsub.f32 %v2072_v13, %v1071_v39  ;;  %v1188_v42 = vsub.f32 %v2062_v9, %v1165_v40 }
 0x650   :  { %1829 = vpow2.f32 %v1148_v38 }
 0x651   :  { %v2204_v44 = vpop.eup %1819  ;;  %v1102_v45 = vmul.f32 1.442695, %v1093_v41  ;;  %v1196_v46 = vmul.f32 1.442695, %v1188_v42 }
 0x652   :  { %v2206_v47 = vpop.eup %1821  ;;  %1226 = vrot.lane.b32.xlu1 %v2204_v44, %s1923_s0  ;;  %v1119_v48 = vpop.permute.xlu1 %1118 }
 0x653   :  { %1831 = vpow2.f32 %v1102_v45  ;;  %v1141_v49 = vsub.f32 %v2072_v13, %v1119_v48  ;;  %1304 = vrot.lane.b32.xlu0 %v2206_v47, %s1924_s29 }
 0x654   :  { %1833 = vpow2.f32 %v1196_v46 }
 0x655   :  { %v2213_v50 = vpop.eup %1823  ;;  %v1150_v51 = vmul.f32 1.442695, %v1141_v49 }
 0x656   :  { %v2215_v52 = vpop.eup %1825  ;;  %1266 = vrot.lane.b32.xlu1 %v2213_v50, %s1922_s28  ;;  %v1167_v53 = vpop.permute.xlu1 %1166 }
 0x657   :  { %1835 = vpow2.f32 %v1150_v51  ;;  %v1189_v54 = vsub.f32 %v2072_v13, %v1167_v53  ;;  %1220 = vrot.lane.b32.xlu0 %v2215_v52, %s1923_s0 }
 0x659   :  { %v2222_v55 = vpop.eup %1827  ;;  %v1198_v56 = vmul.f32 1.442695, %v1189_v54 }
 0x65a   :  { %v2224_v57 = vpop.eup %1829  ;;  %1306 = vrot.lane.b32.xlu1 %v2222_v55, %s1924_s29 }
 0x65b   :  { %1837 = vpow2.f32 %v1198_v56  ;;  %1260 = vrot.lane.b32.xlu0 %v2224_v57, %s1922_s28 }
 0x65d   :  { %v2230_v60 = vpop.eup %1831 }
 0x65e   :  { %v2232_v61 = vpop.eup %1833  ;;  %1222 = vrot.lane.b32.xlu1 %v2230_v60, %s1923_s0 }
 0x65f   :  { %1300 = vrot.lane.b32.xlu0 %v2232_v61, %s1924_s29 }
 0x661   :  { %v2238_v62 = vpop.eup %1835 }
 0x662   :  { %1262 = vrot.lane.b32.xlu1 %v2238_v62, %s1922_s28  ;;  %v1083_v63 = vpop.permute.xlu1 %1082  ;;  %v1081_v2 = vpop.permute.xlu0 %1080 }
 0x663   :  { %v1099_v4 = vsub.f32 %v2084_v15, %v1083_v63  ;;  %v1098_v5 = vsub.f32 %v2082_v14, %v1081_v2 }
 0x665   :  { %v2244_v6 = vpop.eup %1837  ;;  %v1114_v8 = vmul.f32 1.442695, %v1099_v4  ;;  %v1112_v10 = vmul.f32 1.442695, %v1098_v5 }
 0x666   :  { %1302 = vrot.lane.b32.xlu1 %v2244_v6, %s1924_s29  ;;  %v1131_v11 = vpop.permute.xlu1 %1130  ;;  %v1129_v12 = vpop.permute.xlu0 %1128 }
 0x667   :  { %1839 = vpow2.f32 %v1114_v8  ;;  %v1147_v18 = vsub.f32 %v2084_v15, %v1131_v11  ;;  %v1146_v19 = vsub.f32 %v2082_v14, %v1129_v12 }
 0x668   :  { %1841 = vpow2.f32 %v1112_v10 }
 0x669   :  { %v1162_v20 = vmul.f32 1.442695, %v1147_v18  ;;  %v1160_v21 = vmul.f32 1.442695, %v1146_v19 }
 0x66a   :  { %v1079_v22 = vpop.permute.xlu1 %1078  ;;  %v1077_v23 = vpop.permute.xlu0 %1076 }
 0x66b   :  { %1843 = vpow2.f32 %v1162_v20  ;;  %v1097_v25 = vsub.f32 %v2096_v17, %v1079_v22  ;;  %v1096_v26 = vsub.f32 %v2094_v16, %v1077_v23  ;;  %v1038_v22 = vsub.f32 %v2050_v3, %v2115_v24 }
 0x66c   :  { %1845 = vpow2.f32 %v1160_v21 }
 0x66d   :  { %v1110_v28 = vmul.f32 1.442695, %v1097_v25  ;;  %v1108_v29 = vmul.f32 1.442695, %v1096_v26  ;;  %v1048_v23 = vmul.f32 1.442695, %v1038_v22  ;;  %v1039_v25 = vsub.f32 %v2056_v7, %v2123_v32 }
 0x66e   :  { %v1127_v30 = vpop.permute.xlu1 %1126  ;;  %v1125_v31 = vpop.permute.xlu0 %1124 }
 0x66f   :  { %1847 = vpow2.f32 %v1110_v28  ;;  %v1145_v33 = vsub.f32 %v2096_v17, %v1127_v30  ;;  %v1144_v34 = vsub.f32 %v2094_v16, %v1125_v31  ;;  %v1050_v26 = vmul.f32 1.442695, %v1039_v25 }
 0x670   :  { %1849 = vpow2.f32 %v1108_v29  ;;  %v1036_v28 = vsub.f32 %v2062_v9, %v2129_v36 }
 0x671   :  { %v2254_v37 = vpop.eup %1839  ;;  %v1158_v38 = vmul.f32 1.442695, %v1145_v33  ;;  %v1156_v39 = vmul.f32 1.442695, %v1144_v34 }
 0x672   :  { %v2256_v40 = vpop.eup %1841  ;;  %1234 = vrot.lane.b32.xlu1 %v2254_v37, %s1923_s0  ;;  %v1175_v41 = vpop.permute.xlu1 %1174  ;;  %v1044_v30 = vmul.f32 1.442695, %v1036_v28 }
 0x673   :  { %v1173_v42 = vpop.permute.xlu0 %1172  ;;  %1851 = vpow2.f32 %v1158_v38  ;;  %v1193_v45 = vsub.f32 %v2096_v17, %v1175_v41  ;;  %1232 = vrot.lane.b32.xlu0 %v2256_v40, %s1923_s0  ;;  %v1037_v38 = vsub.f32 %v2072_v13, %v2140_v43 }
 0x674   :  { %v1192_v46 = vsub.f32 %v2094_v16, %v1173_v42  ;;  %1853 = vpow2.f32 %v1156_v39 }
 0x675   :  { %v2264_v48 = vpop.eup %1843  ;;  %v1206_v49 = vmul.f32 1.442695, %v1193_v45  ;;  %v1046_v7 = vmul.f32 1.442695, %v1037_v38  ;;  %v1040_v38 = vsub.f32 %v2094_v16, %v2168_v1 }
 0x676   :  { %v1204_v51 = vmul.f32 1.442695, %v1192_v46  ;;  %v2266_v53 = vpop.eup %1845  ;;  %1274 = vrot.lane.b32.xlu1 %v2264_v48, %s1922_s28  ;;  %v1179_v54 = vpop.permute.xlu1 %1178 }
 0x677   :  { %v1177_v56 = vpop.permute.xlu0 %1176  ;;  %1855 = vpow2.f32 %v1206_v49  ;;  %v1195_v63 = vsub.f32 %v2084_v15, %v1179_v54  ;;  %1272 = vrot.lane.b32.xlu0 %v2266_v53, %s1922_s28 }
 0x678   :  { %v1194_v2 = vsub.f32 %v2082_v14, %v1177_v56  ;;  %1857 = vpow2.f32 %v1204_v51 }
 0x679   :  { %v2274_v4 = vpop.eup %1847  ;;  %v1210_v5 = vmul.f32 1.442695, %v1195_v63 }
 0x67a   :  { %v1208_v8 = vmul.f32 1.442695, %v1194_v2  ;;  %v2276_v10 = vpop.eup %1849  ;;  %1230 = vrot.lane.b32.xlu1 %v2274_v4, %s1923_s0 }
 0x67b   :  { %1859 = vpow2.f32 %v1210_v5  ;;  %1228 = vrot.lane.b32.xlu0 %v2276_v10, %s1923_s0 }
 0x67c   :  { %1861 = vpow2.f32 %v1208_v8 }
 0x67d   :  { %v2282_v11 = vpop.eup %1851  ;;  %1863 = vpow2.f32 %v1048_v23 }
 0x67e   :  { %v2284_v12 = vpop.eup %1853  ;;  %1270 = vrot.lane.b32.xlu1 %v2282_v11, %s1922_s28  ;;  %1865 = vpow2.f32 %v1050_v26 }
 0x67f   :  { %1268 = vrot.lane.b32.xlu0 %v2284_v12, %s1922_s28  ;;  %1867 = vpow2.f32 %v1044_v30 }
 0x681   :  { %v2290_v18 = vpop.eup %1855 }
 0x682   :  { %v2292_v19 = vpop.eup %1857  ;;  %1310 = vrot.lane.b32.xlu1 %v2290_v18, %s1924_s29 }
 0x683   :  { %1308 = vrot.lane.b32.xlu0 %v2292_v19, %s1924_s29 }
 0x685   :  { %v2298_v20 = vpop.eup %1859 }
 0x686   :  { %v2300_v21 = vpop.eup %1861  ;;  %1314 = vrot.lane.b32.xlu1 %v2298_v20, %s1924_s29 }
 0x687   :  { %1312 = vrot.lane.b32.xlu0 %v2300_v21, %s1924_s29  ;;  %v1864_v33 = vpop.eup %1863 }
 0x688   :  { %v1866_v32 = vpop.eup %1865 }
 0x689   :  { %v1868_v49 = vpop.eup %1867 }
 0x6bc   :  { %v1225_v29 = vpop.permute.xlu0 %1224 }
 0x6bd   :  { %v1246_v34 = vadd.f32 %v1864_v33, %v1225_v29 }
 0x6c0   :  { %v1265_v31 = vpop.permute.xlu0 %1264 }
 0x6c1   :  { %v1286_v3 = vadd.f32 %v1265_v31, %v1246_v34 }
 0x6c4   :  { %v1227_v24 = vpop.permute.xlu1 %1226 }
 0x6c5   :  { %v1305_v39 = vpop.permute.xlu0 %1304  ;;  %v1247_v45 = vadd.f32 %v1866_v32, %v1227_v24 }
 0x6c6   :  { %v1326_v41 = vadd.f32 %v1305_v39, %v1286_v3  ;;  %v1043_v39 = vsub.f32 %v2084_v15, %v2152_v58 }
 0x6c8   :  { %1869 = vrcp.f32 %v1326_v41  ;;  %v1267_v42 = vpop.permute.xlu1 %1266  ;;  %v1052_v41 = vmul.f32 1.442695, %v1040_v38  ;;  %v1058_v16 = vmul.f32 1.442695, %v1043_v39 }
 0x6c9   :  { %v1221_v9 = vpop.permute.xlu0 %1220  ;;  %1871 = vpow2.f32 %v1046_v7  ;;  %v1287_v36 = vadd.f32 %v1267_v42, %v1247_v45  ;;  %v1042_v7 = vsub.f32 %v2082_v14, %v2154_v59 }
 0x6ca   :  { %v1244_v56 = vadd.f32 %v1868_v49, %v1221_v9 }
 0x6cb   :  { %v1056_v42 = vmul.f32 1.442695, %v1042_v7 }
 0x6cc   :  { %v1307_v46 = vpop.permute.xlu1 %1306 }
 0x6cd   :  { %v1327_v51 = vadd.f32 %v1307_v46, %v1287_v36  ;;  %v1261_v54 = vpop.permute.xlu0 %1260 }
 0x6ce   :  { %v1284_v13 = vadd.f32 %v1261_v54, %v1244_v56 }
 0x6cf   :  { %1873 = vrcp.f32 %v1327_v51 }
 0x6d0   :  { %v1223_v43 = vpop.permute.xlu1 %1222 }
 0x6d1   :  { %v1301_v63 = vpop.permute.xlu0 %1300 }
 0x6d2   :  { %v1870_v2 = vpop.eup %1869  ;;  %v1324_v5 = vadd.f32 %v1301_v63, %v1284_v13 }
 0x6d3   :  { %1360 = vrot.lane.b32.xlu0 %v1870_v2, %s1925_s6  ;;  %v2315_v8 = vmul.f32 %v1870_v2, %v1864_v33  ;;  %v1872_v22 = vpop.eup %1871  ;;  %v1041_v33 = vsub.f32 %v2096_v17, %v2166_v0 }
 0x6d4   :  { %1875 = vrcp.f32 %v1324_v5  ;;  %v1263_v23 = vpop.permute.xlu1 %1262  ;;  %v1245_v25 = vadd.f32 %v1872_v22, %v1223_v43 }
 0x6d5   :  { %v1054_v24 = vmul.f32 1.442695, %v1041_v33 }
 0x6d6   :  { %v1285_v26 = vadd.f32 %v1263_v23, %v1245_v25 }
 0x6d7   :  { %1392 = vrot.lane.b32.xlu0 %v1870_v2, %s1926_s2 }
 0x6d8   :  { %v1303_v28 = vpop.permute.xlu1 %1302 }
 0x6d9   :  { %v1874_v29 = vpop.eup %1873  ;;  %v1325_v30 = vadd.f32 %v1303_v28, %v1285_v26 }
 0x6da   :  { %1362 = vrot.lane.b32.xlu1 %v1874_v29, %s1925_s6  ;;  %v2319_v31 = vmul.f32 %v1874_v29, %v1866_v32 }
 0x6db   :  { %1877 = vrcp.f32 %v1325_v30  ;;  %1424 = vrot.lane.b32.xlu0 %v1870_v2, %s1927_s30 }
 0x6dc   :  { %1879 = vpow2.f32 %v1054_v24 }
 0x6dd   :  { %1881 = vpow2.f32 %v1052_v41 }
 0x6de   :  { %v1876_v34 = vpop.eup %1875  ;;  %1394 = vrot.lane.b32.xlu1 %v1874_v29, %s1926_s2  ;;  %1883 = vpow2.f32 %v1058_v16 }
 0x6df   :  { %1356 = vrot.lane.b32.xlu0 %v1876_v34, %s1925_s6  ;;  %v2328_v3 = vmul.f32 %v1876_v34, %v1868_v49  ;;  %1885 = vpow2.f32 %v1056_v42 }
 0x6e2   :  { %1426 = vrot.lane.b32.xlu1 %v1874_v29, %s1927_s30 }
 0x6e3   :  { %1388 = vrot.lane.b32.xlu0 %v1876_v34, %s1926_s2 }
 0x6e4   :  { %v1235_v17 = vpop.permute.xlu1 %1234 }
 0x6e5   :  { %v1878_v0 = vpop.eup %1877  ;;  %v1233_v32 = vpop.permute.xlu0 %1232 }
 0x6e6   :  { %1358 = vrot.lane.b32.xlu1 %v1878_v0, %s1925_s6  ;;  %v2337_v1 = vmul.f32 %v1878_v0, %v1872_v22  ;;  %v1880_v45 = vpop.eup %1879 }
 0x6e7   :  { %1420 = vrot.lane.b32.xlu0 %v1876_v34, %s1927_s30  ;;  %v1882_v36 = vpop.eup %1881 }
 0x6e8   :  { %v1275_v15 = vpop.permute.xlu1 %1274  ;;  %v1884_v56 = vpop.eup %1883 }
 0x6e9   :  { %v1273_v58 = vpop.permute.xlu0 %1272  ;;  %v1886_v63 = vpop.eup %1885  ;;  %v1251_v2 = vadd.f32 %v1884_v56, %v1235_v17 }
 0x6ea   :  { %1390 = vrot.lane.b32.xlu1 %v1878_v0, %s1926_s2  ;;  %v1250_v23 = vadd.f32 %v1886_v63, %v1233_v32 }
 0x6eb   :  { %v1291_v26 = vadd.f32 %v1275_v15, %v1251_v2 }
 0x6ec   :  { %v1231_v14 = vpop.permute.xlu1 %1230  ;;  %v1290_v28 = vadd.f32 %v1273_v58, %v1250_v23 }
 0x6ed   :  { %v1229_v59 = vpop.permute.xlu0 %1228  ;;  %v1249_v46 = vadd.f32 %v1880_v45, %v1231_v14 }
 0x6ee   :  { %1422 = vrot.lane.b32.xlu1 %v1878_v0, %s1927_s30  ;;  %v1248_v51 = vadd.f32 %v1882_v36, %v1229_v59 }
 0x6f0   :  { %v1271_v9 = vpop.permute.xlu1 %1270 }
 0x6f1   :  { %v1269_v49 = vpop.permute.xlu0 %1268  ;;  %v1289_v54 = vadd.f32 %v1271_v9, %v1249_v46 }
 0x6f2   :  { %v1288_v13 = vadd.f32 %v1269_v49, %v1248_v51 }
 0x6f4   :  { %v1311_v43 = vpop.permute.xlu1 %1310 }
 0x6f5   :  { %v1329_v5 = vadd.f32 %v1311_v43, %v1289_v54  ;;  %v1309_v22 = vpop.permute.xlu0 %1308 }
 0x6f6   :  { %v1328_v25 = vadd.f32 %v1309_v22, %v1288_v13 }
 0x6f7   :  { %1887 = vrcp.f32 %v1329_v5 }
 0x6f8   :  { %1889 = vrcp.f32 %v1328_v25  ;;  %v1315_v29 = vpop.permute.xlu1 %1314 }
 0x6f9   :  { %v1331_v30 = vadd.f32 %v1315_v29, %v1291_v26  ;;  %v1313_v34 = vpop.permute.xlu0 %1312 }
 0x6fa   :  { %v1330_v33 = vadd.f32 %v1313_v34, %v1290_v28 }
 0x6fb   :  { %1891 = vrcp.f32 %v1331_v30 }
 0x6fc   :  { %1893 = vrcp.f32 %v1330_v33 }
 0x701   :  { %v1888_v38 = vpop.eup %1887 }
 0x702   :  { %v1890_v24 = vpop.eup %1889  ;;  %v2342_v39 = vmul.f32 %v1888_v38, %v1880_v45 }
 0x703   :  { %v2344_v41 = vmul.f32 %v1890_v24, %v1882_v36 }
 0x705   :  { %v1892_v7 = vpop.eup %1891 }
 0x706   :  { %v1894_v17 = vpop.eup %1893  ;;  %1370 = vrot.lane.b32.xlu1 %v1892_v7, %s1925_s6  ;;  %v2347_v0 = vmul.f32 %v1892_v7, %v1884_v56 }
 0x707   :  { %1368 = vrot.lane.b32.xlu0 %v1894_v17, %s1925_s6  ;;  %v1346_v32 = vmul.f32 %v1894_v17, %v1886_v63 }
 0x70a   :  { %1402 = vrot.lane.b32.xlu1 %v1892_v7, %s1926_s2 }
 0x70b   :  { %1400 = vrot.lane.b32.xlu0 %v1894_v17, %s1926_s2 }
 0x70e   :  { %1366 = vrot.lane.b32.xlu1 %v1888_v38, %s1925_s6 }
 0x70f   :  { %1364 = vrot.lane.b32.xlu0 %v1890_v24, %s1925_s6 }
 0x712   :  { %1398 = vrot.lane.b32.xlu1 %v1888_v38, %s1926_s2 }
 0x713   :  { %1396 = vrot.lane.b32.xlu0 %v1890_v24, %s1926_s2 }
 0x716   :  { %1430 = vrot.lane.b32.xlu1 %v1888_v38, %s1927_s30 }
 0x717   :  { %1428 = vrot.lane.b32.xlu0 %v1890_v24, %s1927_s30 }
 0x71a   :  { %1434 = vrot.lane.b32.xlu1 %v1892_v7, %s1927_s30 }
 0x71b   :  { %1432 = vrot.lane.b32.xlu0 %v1894_v17, %s1927_s30 }
 0x745   :  { %v1361_v16 = vpop.permute.xlu0 %1360 }
 0x746   :  { %v1382_v15 = vmul.f32 %v2192_v27, %v1361_v16 }
 0x748   :  { %v1455_v45 = vsel %vm1452_vm1, %v2315_v8, %v1382_v15 }
 0x749   :  { %v1393_v42 = vpop.permute.xlu0 %1392 }
 0x74a   :  { %v1414_v58 = vmul.f32 %v2198_v35, %v1393_v42 }
 0x74c   :  { %v1363_v14 = vpop.permute.xlu1 %1362  ;;  %v1464_v36 = vsel %vm1461_vm2, %v1455_v45, %v1414_v58 }
 0x74d   :  { %v1425_v59 = vpop.permute.xlu0 %1424  ;;  %v1383_v27 = vmul.f32 %v2204_v44, %v1363_v14 }
 0x74e   :  { %v1446_v9 = vmul.f32 %v2206_v47, %v1425_v59 }
 0x74f   :  { %v1456_v8 = vsel %vm1452_vm1, %v2319_v31, %v1383_v27 }
 0x750   :  { %v1473_v46 = vsel %vm1470_vm3, %v1464_v36, %v1446_v9  ;;  %v1395_v49 = vpop.permute.xlu1 %1394 }
 0x751   :  { %1482 = vst.msk [vmem:[%s2454_s7 + $0x10] sm:$0xff] %vm1479_vm4, %v1473_v46  ;;  %v1357_v35 = vpop.permute.xlu0 %1356  ;;  %v1415_v51 = vmul.f32 %v2213_v50, %v1395_v49 }
 0x752   :  { %v1380_v43 = vmul.f32 %v2215_v52, %v1357_v35 }
 0x753   :  { %v1465_v13 = vsel %vm1461_vm2, %v1456_v8, %v1415_v51 }
 0x754   :  { %v1427_v54 = vpop.permute.xlu1 %1426  ;;  %v1453_v31 = vsel %vm1452_vm1, %v2328_v3, %v1380_v43 }
 0x755   :  { %v1447_v47 = vmul.f32 %v2222_v55, %v1427_v54  ;;  %v1389_v56 = vpop.permute.xlu0 %1388 }
 0x756   :  { %v1412_v63 = vmul.f32 %v2224_v57, %v1389_v56 }
 0x757   :  { %v1474_v44 = vsel %vm1470_vm3, %v1465_v13, %v1447_v47 }
 0x758   :  { %1483 = vst.msk [vmem:[%s2454_s7 + $0x18] sm:$0xff] %vm1479_vm4, %v1474_v44  ;;  %v1359_v50 = vpop.permute.xlu1 %1358  ;;  %v1462_v5 = vsel %vm1461_vm2, %v1453_v31, %v1412_v63 }
 0x759   :  { %v1421_v2 = vpop.permute.xlu0 %1420  ;;  %v1381_v23 = vmul.f32 %v2230_v60, %v1359_v50 }
 0x75a   :  { %v1444_v55 = vmul.f32 %v2232_v61, %v1421_v2 }
 0x75b   :  { %v1454_v3 = vsel %vm1452_vm1, %v2337_v1, %v1381_v23 }
 0x75c   :  { %v1471_v52 = vsel %vm1470_vm3, %v1462_v5, %v1444_v55  ;;  %v1391_v22 = vpop.permute.xlu1 %1390 }
 0x75d   :  { %1480 = vst.msk [vmem:[%s2454_s7] sm:$0xff] %vm1479_vm4, %v1471_v52  ;;  %v1413_v57 = vmul.f32 %v2238_v62, %v1391_v22 }
 0x75f   :  { %v1463_v26 = vsel %vm1461_vm2, %v1454_v3, %v1413_v57 }
 0x760   :  { %v1423_v25 = vpop.permute.xlu1 %1422 }
 0x761   :  { %v1445_v61 = vmul.f32 %v2244_v6, %v1423_v25 }
 0x763   :  { %v1472_v28 = vsel %vm1470_vm3, %v1463_v26, %v1445_v61 }
 0x764   :  { %1481 = vst.msk [vmem:[%s2454_s7 + $0x8] sm:$0xff] %vm1479_vm4, %v1472_v28 }
 0x778   :  { %v1371_v60 = vpop.permute.xlu1 %1370 }
 0x779   :  { %v1369_v29 = vpop.permute.xlu0 %1368 }
 0x77a   :  { %v1386_v30 = vmul.f32 %v2256_v40, %v1369_v29 }
 0x77c   :  { %v1459_v62 = vsel %vm1452_vm1, %v1346_v32, %v1386_v30  ;;  %v1403_v34 = vpop.permute.xlu1 %1402  ;;  %v1387_v32 = vmul.f32 %v2254_v37, %v1371_v60 }
 0x77d   :  { %v1401_v33 = vpop.permute.xlu0 %1400  ;;  %v1419_v45 = vmul.f32 %v2264_v48, %v1403_v34 }
 0x77e   :  { %v1418_v1 = vmul.f32 %v2266_v53, %v1401_v33  ;;  %v1460_v48 = vsel %vm1452_vm1, %v2347_v0, %v1387_v32 }
 0x780   :  { %v1468_v6 = vsel %vm1461_vm2, %v1459_v62, %v1418_v1  ;;  %v1367_v38 = vpop.permute.xlu1 %1366 }
 0x781   :  { %v1365_v24 = vpop.permute.xlu0 %1364  ;;  %v1385_v17 = vmul.f32 %v2274_v4, %v1367_v38 }
 0x782   :  { %v1384_v42 = vmul.f32 %v2276_v10, %v1365_v24 }
 0x783   :  { %v1458_v53 = vsel %vm1452_vm1, %v2342_v39, %v1385_v17 }
 0x784   :  { %v1399_v7 = vpop.permute.xlu1 %1398  ;;  %v1457_v4 = vsel %vm1452_vm1, %v2344_v41, %v1384_v42  ;;  %v1469_v41 = vsel %vm1461_vm2, %v1460_v48, %v1419_v45 }
 0x785   :  { %v1397_v16 = vpop.permute.xlu0 %1396  ;;  %v1417_v15 = vmul.f32 %v2282_v11, %v1399_v7 }
 0x786   :  { %v1416_v40 = vmul.f32 %v2284_v12, %v1397_v16 }
 0x787   :  { %v1467_v10 = vsel %vm1461_vm2, %v1458_v53, %v1417_v15 }
 0x788   :  { %v1431_v58 = vpop.permute.xlu1 %1430  ;;  %v1466_v12 = vsel %vm1461_vm2, %v1457_v4, %v1416_v40 }
 0x789   :  { %v1449_v14 = vmul.f32 %v2290_v18, %v1431_v58  ;;  %v1429_v59 = vpop.permute.xlu0 %1428 }
 0x78a   :  { %v1448_v11 = vmul.f32 %v2292_v19, %v1429_v59 }
 0x78b   :  { %v1476_v9 = vsel %vm1470_vm3, %v1467_v10, %v1449_v14 }
 0x78c   :  { %1485 = vst.msk [vmem:[%s2454_s7 + $0x28] sm:$0xff] %vm1479_vm4, %v1476_v9  ;;  %v1475_v37 = vsel %vm1470_vm3, %v1466_v12, %v1448_v11  ;;  %v1435_v18 = vpop.permute.xlu1 %1434 }
 0x78d   :  { %1484 = vst.msk [vmem:[%s2454_s7 + $0x20] sm:$0xff] %vm1479_vm4, %v1475_v37  ;;  %v1451_v19 = vmul.f32 %v2298_v20, %v1435_v18  ;;  %v1433_v39 = vpop.permute.xlu0 %1432 }
 0x78e   :  { %v1450_v36 = vmul.f32 %v2300_v21, %v1433_v39 }
 0x78f   :  { %v1478_v46 = vsel %vm1470_vm3, %v1469_v41, %v1451_v19 }
 0x790   :  { %1487 = vst.msk [vmem:[%s2454_s7 + $0x38] sm:$0xff] %vm1479_vm4, %v1478_v46  ;;  %v1477_v0 = vsel %vm1470_vm3, %v1468_v6, %v1450_v36 }
 0x791   :  { %1486 = vst.msk [vmem:[%s2454_s7 + $0x30] sm:$0xff] %vm1479_vm4, %v1477_v0 }
 0x792   :  { %1492 = vsyncpa [#allocation3], 1 }

</bundles_post_ra>
